<compile_context>
chip_gen: v7x
topology: tpu7x:2x2x1
jax: 0.10.0
libtpu: 0.0.40
codegen_flags: <defaults>
</compile_context>

<pallas_src>
import jax
import jax.numpy as jnp
from jax.experimental import pallas as pl
from jax.experimental.pallas import tpu as pltpu

IN_FEATURES = 3072   # 3 * 32 * 32
HIDDEN = 128
OUT_FEATURES = 10
OUT_PADDED = 128     # fc2 lane dim padded to a full 128-lane tile (unmasked stores)


def mlp_kernel(x_ref, w1_ref, b1_ref, w2_ref, b2_ref, o_ref):
    # In-kernel cast of the x tile (VMEM-resident, bandwidth-neutral). No-op when f32.
    x = x_ref[...].astype(w1_ref.dtype)
    # fc1: (TB, 3072) @ (3072, 128) on the MXU with f32 accumulation.
    h = jnp.dot(x, w1_ref[...], preferred_element_type=jnp.float32)
    # Bias + ReLU on the VPU.
    h = jnp.maximum(h + b1_ref[...], 0.0)
    # fc2 against lane-padded (128, 128) weights -> lane-dense (TB, 128) output tile.
    out = jnp.dot(h.astype(w2_ref.dtype), w2_ref[...], preferred_element_type=jnp.float32)
    o_ref[...] = (out + b2_ref[...]).astype(o_ref.dtype)


def prepare_params(w1, b1, w2, b2, dtype=jnp.float32):
    """One-time conversion of PyTorch-layout params to the kernel layout.

    w1: (128, 3072), b1: (128,), w2: (10, 128), b2: (10,) -- PyTorch nn.Linear conventions.
    Transpose + lane padding are hoisted here so they are never re-materialized per forward.
    Pass dtype=jnp.bfloat16 for the serving path (halves weight DMA / x-tile bytes; f32
    accumulation kept; expect ~1e-2 divergence vs f32). Biases stay f32.
    """
    w1_t = jnp.asarray(w1, dtype).T                               # (3072, 128)
    b1_2d = jnp.asarray(b1, jnp.float32)[None, :]                 # (1, 128)
    w2_t = jnp.asarray(w2, dtype).T                               # (128, 10)
    w2_pad = jnp.zeros((HIDDEN, OUT_PADDED), dtype).at[:, :OUT_FEATURES].set(w2_t)
    b2_pad = jnp.zeros((1, OUT_PADDED), jnp.float32).at[0, :OUT_FEATURES].set(
        jnp.asarray(b2, jnp.float32))
    return w1_t, b1_2d, w2_pad, b2_pad


def _round_up(x, m):
    return ((x + m - 1) // m) * m


def _vmem_bytes_estimate(tb, x_itemsize, w_itemsize):
    """Double-buffered VMEM footprint of one grid step (Pallas pipeliner default)."""
    x_tile = tb * IN_FEATURES * x_itemsize
    out_tile = tb * OUT_PADDED * 4
    weights = (IN_FEATURES * HIDDEN + HIDDEN * OUT_PADDED) * w_itemsize
    biases = (HIDDEN + OUT_PADDED) * 4
    return 2 * (x_tile + out_tile + weights + biases)


def simple_nn_forward(x_nchw, kernel_params, *, block_b=256):
    """Forward pass matching PyTorch SimpleNN. Returns logits (B, 10) float32.

    block_b guidance:
      v5e: 256 (fits the 16 MiB default scoped VMEM with f32 x); v6e: 256-512;
      v7x: 256-512 (64 MiB physical VMEM; the parallel batch axis shards grid steps across
      both TensorCores). Larger block_b automatically gets an explicit vmem_limit_bytes.
    """
    w1_t, b1_2d, w2_pad, b2_pad = kernel_params

    B = x_nchw.shape[0]
    # x.view(-1, 3072): row-major flatten of NCHW (same as PyTorch contiguous view).
    # NOTE: no dtype cast here -- the cast happens on the VMEM tile inside the kernel.
    x2d = x_nchw.reshape(B, IN_FEATURES)

    # Pick the batch tile. The sublane rule requires tb % 8 == 0 unless tb covers the full batch.
    block_b = max(8, _round_up(block_b, 8))
    if B <= 8:
        tb = B                                   # single full block (latency path)
    elif B <= block_b:
        # Force >= 2 grid steps so v7x's 2 TensorCores both get work ("parallel" batch axis).
        # Costs only one extra ~0.35 us grid step on single-TC v5e/v6e.
        tb = min(block_b, max(8, _round_up(pl.cdiv(B, 2), 8)))
    else:
        tb = block_b
    grid = (pl.cdiv(B, tb),)                     # ragged boundary block is masked by Pallas

    # Only override the scoped-VMEM limit when the tiles might exceed the per-chip default
    # (v5e default is 16 MiB); otherwise leave the compiler default untouched.
    est = _vmem_bytes_estimate(tb, jnp.dtype(x2d.dtype).itemsize,
                               jnp.dtype(w1_t.dtype).itemsize)
    vmem_limit = int(est * 1.25) + (2 << 20) if est > (12 << 20) else None

    out_padded = pl.pallas_call(
        mlp_kernel,
        out_shape=jax.ShapeDtypeStruct((B, OUT_PADDED), jnp.float32),
        grid=grid,
        in_specs=[
            # x streams HBM->VMEM one (tb, 3072) tile per grid step (double-buffered).
            pl.BlockSpec((tb, IN_FEATURES), lambda i: (i, 0)),
            # Weights/biases: constant index_map -> DMA'd once, VMEM-resident across steps.
            pl.BlockSpec((IN_FEATURES, HIDDEN), lambda i: (0, 0)),
            pl.BlockSpec((1, HIDDEN), lambda i: (0, 0)),
            pl.BlockSpec((HIDDEN, OUT_PADDED), lambda i: (0, 0)),
            pl.BlockSpec((1, OUT_PADDED), lambda i: (0, 0)),
        ],
        out_specs=pl.BlockSpec((tb, OUT_PADDED), lambda i: (i, 0)),
        compiler_params=pltpu.CompilerParams(
            # Batch axis is fully independent -> parallel (shards across v7x's 2 TCs).
            dimension_semantics=("parallel",),
            vmem_limit_bytes=vmem_limit,
        ),
    )(x2d, w1_t, b1_2d, w2_pad, b2_pad)

    # Strip the fc2 lane padding (10 valid logits). Keep the padded slab if the consumer can
    # take (B, 128) directly -- the slice is a tiny extra XLA pass.
    return out_padded[:, :OUT_FEATURES]


def init_params(key):
    """Deterministic synthetic params with PyTorch nn.Linear shapes."""
    k1, k2, k3, k4 = jax.random.split(key, 4)
    w1 = jax.random.uniform(k1, (HIDDEN, IN_FEATURES), jnp.float32,
                            minval=-1.0, maxval=1.0) / jnp.sqrt(IN_FEATURES)
    b1 = jax.random.uniform(k2, (HIDDEN,), jnp.float32,
                            minval=-1.0, maxval=1.0) / jnp.sqrt(IN_FEATURES)
    w2 = jax.random.uniform(k3, (OUT_FEATURES, HIDDEN), jnp.float32,
                            minval=-1.0, maxval=1.0) / jnp.sqrt(HIDDEN)
    b2 = jax.random.uniform(k4, (OUT_FEATURES,), jnp.float32,
                            minval=-1.0, maxval=1.0) / jnp.sqrt(HIDDEN)
    return w1, b1, w2, b2


def reference_forward(x_nchw, w1, b1, w2, b2):
    """Pure-JAX reference mirroring the PyTorch forward."""
    B = x_nchw.shape[0]
    x = x_nchw.reshape(B, IN_FEATURES)
    h = jnp.maximum(x @ w1.T + b1, 0.0)
    return h @ w2.T + b2


if __name__ == "__main__":
    key = jax.random.PRNGKey(0)
    kx, kp = jax.random.split(key)

    # CIFAR-10-shaped input at small batch: (B=2, C=3, H=32, W=32), NCHW like PyTorch.
    x = jax.random.normal(kx, (2, 3, 32, 32), jnp.float32)
    w1, b1, w2, b2 = init_params(kp)

    params = prepare_params(w1, b1, w2, b2)        # one-time weight prep (hoisted transpose/pad)

    out = jax.block_until_ready(simple_nn_forward(x, params))   # small-batch path (grid=(1,))
    ref = reference_forward(x, w1, b1, w2, b2)
    assert out.shape == (2, OUT_FEATURES)
    assert jnp.allclose(out, ref, atol=1e-4, rtol=1e-4), "Pallas output mismatch vs reference"

    # Ragged multi-step path: B=20, block_b=8 -> grid=(3,) with a masked boundary block
    # (no explicit zero-padding copy of x).
    xb = jax.random.normal(jax.random.PRNGKey(1), (20, 3, 32, 32), jnp.float32)
    out_b = jax.block_until_ready(simple_nn_forward(xb, params, block_b=8))
    ref_b = reference_forward(xb, w1, b1, w2, b2)
    assert out_b.shape == (20, OUT_FEATURES)
    assert jnp.allclose(out_b, ref_b, atol=1e-4, rtol=1e-4), "Tiled-path mismatch vs reference"

    # bf16 serving path: bf16 weights in HBM, x kept f32 in HBM and cast per-tile in-kernel;
    # also exercises the forced >=2-grid-step megacore split (B=20 <= block_b=256 -> tb=16).
    params_bf16 = prepare_params(w1, b1, w2, b2, dtype=jnp.bfloat16)
    out_h = jax.block_until_ready(simple_nn_forward(xb, params_bf16))
    assert out_h.shape == (20, OUT_FEATURES)
    assert jnp.allclose(out_h, ref_b, atol=7.5e-2, rtol=5e-2), "bf16-path mismatch vs reference"

    print("KERNEL_OK")
</pallas_src>

<mosaic_0001>
module attributes {stable_mosaic.version = 11 : i64} {
  func.func @mlp_kernel(%arg0: i32, %arg1: memref<2x3072xf32, #tpu.memory_space<vmem>>, %arg2: memref<3072x128xf32, #tpu.memory_space<vmem>>, %arg3: memref<1x128xf32, #tpu.memory_space<vmem>>, %arg4: memref<128x128xf32, #tpu.memory_space<vmem>>, %arg5: memref<1x128xf32, #tpu.memory_space<vmem>>, %arg6: memref<2x128xf32, #tpu.memory_space<vmem>>) attributes {dimension_semantics = [#tpu.dimension_semantics<parallel>], iteration_bounds = array<i64: 1>, scalar_prefetch = 0 : i64, scratch_operands = 0 : i64, tpu.core_type = #tpu.core_type<tc>, window_params = [{transform_indices = @transform_0, window_bounds = array<i64: 2, 3072>}, {pipeline_mode = #tpu.pipeline_mode<synchronous>, transform_indices = @transform_1, window_bounds = array<i64: 3072, 128>}, {pipeline_mode = #tpu.pipeline_mode<synchronous>, transform_indices = @transform_2, window_bounds = array<i64: 1, 128>}, {pipeline_mode = #tpu.pipeline_mode<synchronous>, transform_indices = @transform_3, window_bounds = array<i64: 128, 128>}, {pipeline_mode = #tpu.pipeline_mode<synchronous>, transform_indices = @transform_4, window_bounds = array<i64: 1, 128>}, {transform_indices = @transform_5, window_bounds = array<i64: 2, 128>}]} {
    %c0 = arith.constant 0 : index
    %c0_0 = arith.constant 0 : index
    %0 = vector.load %arg1[%c0, %c0_0] : memref<2x3072xf32, #tpu.memory_space<vmem>>, vector<2x3072xf32>
    %c0_1 = arith.constant 0 : index
    %c0_2 = arith.constant 0 : index
    %1 = vector.load %arg2[%c0_1, %c0_2] : memref<3072x128xf32, #tpu.memory_space<vmem>>, vector<3072x128xf32>
    %cst = arith.constant dense<0.000000e+00> : vector<2x128xf32>
    %2 = tpu.matmul %0, %1, %cst {dimension_numbers = #tpu.dot_dimension_numbers<[1], [0], [0], [1], [0, 0, 1, 1], [], []>} : vector<2x3072xf32>, vector<3072x128xf32>, vector<2x128xf32> -> vector<2x128xf32>
    %c0_3 = arith.constant 0 : index
    %c0_4 = arith.constant 0 : index
    %3 = vector.load %arg3[%c0_3, %c0_4] : memref<1x128xf32, #tpu.memory_space<vmem>>, vector<1x128xf32>
    %4 = vector.broadcast %3 : vector<1x128xf32> to vector<2x128xf32>
    %5 = arith.addf %2, %4 : vector<2x128xf32>
    %cst_5 = arith.constant 0.000000e+00 : f32
    %6 = vector.broadcast %cst_5 : f32 to vector<2x128xf32>
    %7 = arith.maximumf %5, %6 : vector<2x128xf32>
    %c0_6 = arith.constant 0 : index
    %c0_7 = arith.constant 0 : index
    %8 = vector.load %arg4[%c0_6, %c0_7] : memref<128x128xf32, #tpu.memory_space<vmem>>, vector<128x128xf32>
    %cst_8 = arith.constant dense<0.000000e+00> : vector<2x128xf32>
    %9 = tpu.matmul %7, %8, %cst_8 {dimension_numbers = #tpu.dot_dimension_numbers<[1], [0], [0], [1], [0, 0, 1, 1], [], []>} : vector<2x128xf32>, vector<128x128xf32>, vector<2x128xf32> -> vector<2x128xf32>
    %c0_9 = arith.constant 0 : index
    %c0_10 = arith.constant 0 : index
    %10 = vector.load %arg5[%c0_9, %c0_10] : memref<1x128xf32, #tpu.memory_space<vmem>>, vector<1x128xf32>
    %11 = vector.broadcast %10 : vector<1x128xf32> to vector<2x128xf32>
    %12 = arith.addf %9, %11 : vector<2x128xf32>
    %c0_11 = arith.constant 0 : index
    %c0_12 = arith.constant 0 : index
    %13 = vector.load %arg6[%c0_11, %c0_12] : memref<2x128xf32, #tpu.memory_space<vmem>>, vector<2x128xf32>
    tpu.vector_store %arg6[%c0_11, %c0_12], %12 {strides = array<i32>} : memref<2x128xf32, #tpu.memory_space<vmem>>, vector<2x128xf32>,
    return
  }
  func.func @transform_0(%arg0: i32) -> (i32, i32) {
    %c0_i32 = arith.constant 0 : i32
    %c0_i32_0 = arith.constant 0 : i32
    return %arg0, %c0_i32 : i32, i32
  }
  func.func @transform_1(%arg0: i32) -> (i32, i32) {
    %c0_i32 = arith.constant 0 : i32
    %c0_i32_0 = arith.constant 0 : i32
    %c0_i32_1 = arith.constant 0 : i32
    return %c0_i32, %c0_i32_0 : i32, i32
  }
  func.func @transform_2(%arg0: i32) -> (i32, i32) {
    %c0_i32 = arith.constant 0 : i32
    %c0_i32_0 = arith.constant 0 : i32
    %c0_i32_1 = arith.constant 0 : i32
    return %c0_i32, %c0_i32_0 : i32, i32
  }
  func.func @transform_3(%arg0: i32) -> (i32, i32) {
    %c0_i32 = arith.constant 0 : i32
    %c0_i32_0 = arith.constant 0 : i32
    %c0_i32_1 = arith.constant 0 : i32
    return %c0_i32, %c0_i32_0 : i32, i32
  }
  func.func @transform_4(%arg0: i32) -> (i32, i32) {
    %c0_i32 = arith.constant 0 : i32
    %c0_i32_0 = arith.constant 0 : i32
    %c0_i32_1 = arith.constant 0 : i32
    return %c0_i32, %c0_i32_0 : i32, i32
  }
  func.func @transform_5(%arg0: i32) -> (i32, i32) {
    %c0_i32 = arith.constant 0 : i32
    %c0_i32_0 = arith.constant 0 : i32
    return %arg0, %c0_i32 : i32, i32
  }
}

</mosaic_0001>

<bundles_post_ra>
// kernel: tpu_custom_call.1
= control target key start
LH: loop header
LB: loop body
LE: loop exit
PB: predicated region body
PF: predicated region fallthrough
CT: control target
= control target key end

     0   :  { %10 = vsyncpa [#allocation3], 0  ;;  %s2782_s0 = inlined_call_operand.hbm [shape: f32[2,3072], index: 0, kind: input, shape index: {}]   ;;  %s2783_s1 = inlined_call_operand.hbm [shape: f32[3072,128], index: 1, kind: input, shape index: {}]   ;;  %s2784_s2 = inlined_call_operand.hbm [shape: f32[1,128], index: 2, kind: input, shape index: {}]   ;;  %s2785_s3 = inlined_call_operand.hbm [shape: f32[128,128], index: 3, kind: input, shape index: {}]   ;;  %s2786_s4 = inlined_call_operand.hbm [shape: f32[1,128], index: 4, kind: input, shape index: {}]   ;;  %s2787_s5 = inlined_call_operand.hbm [shape: f32[2,128], index: 5, kind: output, shape index: {}]  }
   0x1   :  { %11 = vsyncpa [#allocation6], 0 }
   0x2   :  { %12 = vsyncpa [#allocation9], 0 }
   0x3   :  { %13 = vsyncpa [#allocation4], 0  ;;  %s2604_s18 = smov [#allocation5]   ;;  %s2464_s22 = scalar_lea.hbm %s2783_s1, 49152 }
   0x4   :  { %s29_s19 = sshll.u32 %s2604_s18, 4  ;;  %p2465_p0 = scmp.ne.s32.totalorder %s2783_s1, %s2464_s22  ;;  %s30_s19 = int_to_ptr.vmem [resolvable:$true] %s29_s19 }
   0x5   :  { %p2468_p1 = scmp.lt.u32.totalorder %s2464_s22, %s2783_s1 }
   0x7   :  { %p2470_p2 = pnand %p2468_p1, %p2465_p0 }
   0x9   :  { %2473 = shalt.err (!%p2470_p2)
}
   0xa   :  { %s2474_s27 = scalar_lea.vmem %s30_s19, 49152  ;;  %p2479_p4 = scmp.lt.s32.totalorder %s30_s19, %s30_s19 }
   0xb   :  { %p2475_p3 = scmp.ne.s32.totalorder %s30_s19, %s2474_s27  ;;  %p2480_p5 = scmp.lt.s32.totalorder %s2474_s27, %s2474_s27 }
   0xd   :  { %p2481_p6 = por %p2480_p5, %p2479_p4 }
   0xf   :  { %p2482_p7 = pnand %p2481_p6, %p2475_p3 }
  0x11   :  { %2485 = shalt.err (!%p2482_p7)
}
  0x12   :  { %s2605_s28 = smov 128   ;;  %s2606_s29 = smov 8  }
  0x13   :  { %35 = dma.hbm_to_vmem [thread:$0]  %s2783_s1, 49152, %s30_s19, [#allocation6], %s2605_s28, %s2605_s28, %s2606_s29  }
  0x14   :  { %s2607_s7 = smov [#allocation8]   ;;  %s2608_s9 = smov [#allocation2]  }
  0x15   :  { %s51_s8 = sshll.u32 %s2607_s7, 4  ;;  %s20_s10 = sshll.u32 %s2608_s9, 4  ;;  %s52_s8 = int_to_ptr.vmem [resolvable:$true] %s51_s8  ;;  %s21_s10 = int_to_ptr.vmem [resolvable:$true] %s20_s10 }
  0x16   :  { %s2486_s13 = scalar_lea.hbm %s2785_s3, 2048 }
  0x17   :  { %p2487_p8 = scmp.ne.s32.totalorder %s2785_s3, %s2486_s13  ;;  %p2490_p9 = scmp.lt.u32.totalorder %s2486_s13, %s2785_s3 }
  0x19   :  { %p2492_p10 = pnand %p2490_p9, %p2487_p8 }
  0x1b   :  { %2495 = shalt.err (!%p2492_p10)
}
  0x1c   :  { %s2496_s1 = scalar_lea.vmem %s52_s8, 2048  ;;  %p2501_p12 = scmp.lt.s32.totalorder %s52_s8, %s52_s8 }
  0x1d   :  { %p2497_p11 = scmp.ne.s32.totalorder %s52_s8, %s2496_s1  ;;  %p2502_p13 = scmp.lt.s32.totalorder %s2496_s1, %s2496_s1 }
  0x1f   :  { %p2503_p0 = por %p2502_p13, %p2501_p12 }
  0x21   :  { %p2504_p1 = pnand %p2503_p0, %p2497_p11 }
  0x23   :  { %2507 = shalt.err (!%p2504_p1)
}
  0x24   :  { %57 = dma.hbm_to_vmem [thread:$0]  %s2785_s3, 2048, %s52_s8, [#allocation9], %s2605_s28, %s2605_s28, %s2606_s29  }
  0x25   :  { %s2508_s22 = scalar_lea.hbm %s2782_s0, 768 }
  0x26   :  { %p2509_p2 = scmp.ne.s32.totalorder %s2782_s0, %s2508_s22  ;;  %p2512_p3 = scmp.lt.u32.totalorder %s2508_s22, %s2782_s0 }
  0x28   :  { %p2514_p4 = pnand %p2512_p3, %p2509_p2 }
  0x2a   :  { %2517 = shalt.err (!%p2514_p4)
}
  0x2b   :  { %s2518_s27 = scalar_lea.vmem %s21_s10, 768  ;;  %p2523_p6 = scmp.lt.s32.totalorder %s21_s10, %s21_s10 }
  0x2c   :  { %p2519_p5 = scmp.ne.s32.totalorder %s21_s10, %s2518_s27  ;;  %p2524_p7 = scmp.lt.s32.totalorder %s2518_s27, %s2518_s27 }
  0x2e   :  { %p2525_p8 = por %p2524_p7, %p2523_p6 }
  0x30   :  { %p2526_p9 = pnand %p2525_p8, %p2519_p5 }
  0x32   :  { %2529 = shalt.err (!%p2526_p9)
}
  0x33   :  { %23 = dma.hbm_to_vmem [thread:$0]  %s2782_s0, 768, %s21_s10, [#allocation3]  }
  0x34   :  { %s2609_s29 = smov [#allocation7]   ;;  %s2610_s6 = smov [#allocation10]  }
  0x35   :  { %s42_s30 = sshll.u32 %s2609_s29, 4  ;;  %s64_s7 = sshll.u32 %s2610_s6, 4  ;;  %s43_s30 = int_to_ptr.vmem [resolvable:$true] %s42_s30  ;;  %s65_s7 = int_to_ptr.vmem [resolvable:$true] %s64_s7 }
  0x36   :  { %s2530_s11 = scalar_lea.hbm %s2784_s2, 16 }
  0x37   :  { %p2531_p10 = scmp.ne.s32.totalorder %s2784_s2, %s2530_s11  ;;  %p2534_p11 = scmp.lt.u32.totalorder %s2530_s11, %s2784_s2 }
  0x39   :  { %p2536_p12 = pnand %p2534_p11, %p2531_p10 }
  0x3b   :  { %2539 = shalt.err (!%p2536_p12)
}
  0x3c   :  { %s2540_s0 = scalar_lea.vmem %s43_s30, 16  ;;  %s2544_s10 = scalar_lea.vmem %s43_s30, 32 }
  0x3d   :  { %p2541_p13 = scmp.ne.s32.totalorder %s43_s30, %s2540_s0  ;;  %p2545_p0 = scmp.lt.s32.totalorder %s43_s30, %s43_s30 }
  0x3e   :  { %p2546_p1 = scmp.lt.s32.totalorder %s2544_s10, %s2540_s0 }
  0x40   :  { %p2547_p2 = por %p2546_p1, %p2545_p0 }
  0x42   :  { %p2548_p3 = pnand %p2547_p2, %p2541_p13 }
  0x44   :  { %2551 = shalt.err (!%p2548_p3)
}
  0x45   :  { %45 = dma.hbm_to_vmem [thread:$0]  %s2784_s2, 16, %s43_s30, [#allocation6]  }
  0x46   :  { %s2552_s19 = scalar_lea.hbm %s2786_s4, 16 }
  0x47   :  { %p2553_p4 = scmp.ne.s32.totalorder %s2786_s4, %s2552_s19  ;;  %p2556_p5 = scmp.lt.u32.totalorder %s2552_s19, %s2786_s4 }
  0x49   :  { %p2558_p6 = pnand %p2556_p5, %p2553_p4 }
  0x4b   :  { %2561 = shalt.err (!%p2558_p6)
}
  0x4c   :  { %s2562_s24 = scalar_lea.vmem %s65_s7, 16  ;;  %s2566_s25 = scalar_lea.vmem %s65_s7, 32 }
  0x4d   :  { %p2563_p7 = scmp.ne.s32.totalorder %s65_s7, %s2562_s24  ;;  %p2567_p8 = scmp.lt.s32.totalorder %s65_s7, %s65_s7 }
  0x4e   :  { %p2568_p9 = scmp.lt.s32.totalorder %s2566_s25, %s2562_s24 }
  0x50   :  { %p2569_p10 = por %p2568_p9, %p2567_p8 }
  0x52   :  { %p2570_p11 = pnand %p2569_p10, %p2563_p7 }
  0x54   :  { %2573 = shalt.err (!%p2570_p11)
}
  0x55   :  { %67 = dma.hbm_to_vmem [thread:$0]  %s2786_s4, 16, %s65_s7, [#allocation9]  }
  0x56   :  { %2596 = dma.done.wait [#allocation3], 768  }
  0x57   :  { %2597 = vsyncadd [#allocation3], 4294966528 }
  0x58   :  { %2598 = dma.done.wait [#allocation6], 49168  }
  0x59   :  { %2599 = vsyncadd [#allocation6], 4294918128 }
  0x5a   :  { %2600 = dma.done.wait [#allocation9], 2064  }
  0x5b   :  { %2601 = vsyncadd [#allocation9], 4294965232  ;;  %v105_v0 = vld [vmem:[#allocation5 + $0x80] sm:$0xff]  ;;  %v106_v1 = vld [vmem:[#allocation5 + $0x88] sm:$0xff]  ;;  %v2611_v47 = vmov 1983009808   ;;  %v490_v49 = vlaneseq }
  0x5c   :  { %v89_v2 = vld [vmem:[#allocation5] sm:$0xff]  ;;  %v2038_v3 = vpack.c.bf16 %v106_v1, %v105_v0  ;;  %v90_v4 = vld [vmem:[#allocation5 + $0x8] sm:$0xff]  ;;  %v107_v11 = vld [vmem:[#allocation5 + $0x90] sm:$0xff]  ;;  %v488_v48 = vunpack.c.l.s4 %v2611_v47  ;;  %vm2613_vm0 = vmmov 0   ;;  %s2615_s4 = smov [#allocation11]  }
  0x5d   :  { %v137_v5 = vld [vmem:[#allocation5 + $0x180] sm:$0xff]  ;;  %v138_v6 = vld [vmem:[#allocation5 + $0x188] sm:$0xff]  ;;  %v2040_v7 = vpack.c.bf16 %v90_v4, %v89_v2  ;;  %v108_v13 = vld [vmem:[#allocation5 + $0x98] sm:$0xff]  ;;  %v491_v0 = vshrl.u32 %v490_v49, 7  ;;  %s1553_s27 = sshll.u32 %s2615_s4, 4  ;;  %s1554_s27 = int_to_ptr.vmem [resolvable:$true] %s1553_s27 }
  0x5e   :  { %v2070_v8 = vpack.c.bf16 %v138_v6, %v137_v5  ;;  %v121_v9 = vld [vmem:[#allocation5 + $0x100] sm:$0xff]  ;;  %v122_v10 = vld [vmem:[#allocation5 + $0x108] sm:$0xff]  ;;  %2039 = vmatprep.subr.bf16.mxu0 %v2038_v3  ;;  %v91_v14 = vld [vmem:[#allocation5 + $0x10] sm:$0xff]  ;;  %v2042_v16 = vpack.c.bf16 %v108_v13, %v107_v11  ;;  %v489_v63 = vunpack.c.0.s8 %v488_v48  ;;  %s2574_s3 = scalar_lea.vmem %s1554_s27, 32  ;;  %p2579_p13 = scmp.lt.s32.totalorder %s1554_s27, %s1554_s27 }
  0x5f   :  { %v2072_v12 = vpack.c.bf16 %v122_v10, %v121_v9  ;;  %v92_v15 = vld [vmem:[#allocation5 + $0x18] sm:$0xff]  ;;  %2041 = vmatpush3.bf16.msra.mxu0 %v2040_v7  ;;  %v139_v18 = vld [vmem:[#allocation5 + $0x190] sm:$0xff]  ;;  %v109_v23 = vld [vmem:[#allocation5 + $0xa0] sm:$0xff]  ;;  %p2575_p12 = scmp.ne.s32.totalorder %s1554_s27, %s2574_s3  ;;  %p2580_p0 = scmp.lt.s32.totalorder %s2574_s3, %s2574_s3 }
  0x60   :  { %2071 = vmatprep.subr.bf16.mxu1 %v2070_v8  ;;  %v2044_v17 = vpack.c.bf16 %v92_v15, %v91_v14  ;;  %v140_v19 = vld [vmem:[#allocation5 + $0x198] sm:$0xff]  ;;  %v123_v20 = vld [vmem:[#allocation5 + $0x110] sm:$0xff]  ;;  %v110_v24 = vld [vmem:[#allocation5 + $0xa8] sm:$0xff]  ;;  %2043 = vmatprep.subr.bf16.mxu0 %v2042_v16  ;;  %v2706_v13 = vsub.s32 %v489_v63, %v491_v0 }
  0x61   :  { %2073 = vmatpush3.bf16.msra.mxu1 %v2072_v12  ;;  %v2074_v21 = vpack.c.bf16 %v140_v19, %v139_v18  ;;  %v124_v22 = vld [vmem:[#allocation5 + $0x118] sm:$0xff]  ;;  %v2046_v26 = vpack.c.bf16 %v110_v24, %v109_v23  ;;  %v93_v27 = vld [vmem:[#allocation5 + $0x20] sm:$0xff]  ;;  %v94_v28 = vld [vmem:[#allocation5 + $0x28] sm:$0xff]  ;;  %p2581_p1 = por %p2580_p0, %p2579_p13 }
  0x62   :  { %v2076_v25 = vpack.c.bf16 %v124_v22, %v123_v20  ;;  %v141_v29 = vld [vmem:[#allocation5 + $0x1a0] sm:$0xff]  ;;  %v142_v30 = vld [vmem:[#allocation5 + $0x1a8] sm:$0xff]  ;;  %v2048_v33 = vpack.c.bf16 %v94_v28, %v93_v27  ;;  %v111_v35 = vld [vmem:[#allocation5 + $0xb0] sm:$0xff] }
  0x63   :  { %2075 = vmatprep.subr.bf16.mxu1 %v2074_v21  ;;  %v125_v31 = vld [vmem:[#allocation5 + $0x120] sm:$0xff]  ;;  %v126_v32 = vld [vmem:[#allocation5 + $0x128] sm:$0xff]  ;;  %2045 = vmatpush3.bf16.msra.mxu0 %v2044_v17  ;;  %v2078_v34 = vpack.c.bf16 %v142_v30, %v141_v29  ;;  %v112_v36 = vld [vmem:[#allocation5 + $0xb8] sm:$0xff]  ;;  %p2582_p2 = pnand %p2581_p1, %p2575_p12 }
  0x64   :  { %v95_v37 = vld [vmem:[#allocation5 + $0x30] sm:$0xff]  ;;  %2047 = vmatprep.subr.bf16.mxu0 %v2046_v26  ;;  %v2080_v38 = vpack.c.bf16 %v126_v32, %v125_v31  ;;  %v2050_v39 = vpack.c.bf16 %v112_v36, %v111_v35  ;;  %v96_v40 = vld [vmem:[#allocation5 + $0x38] sm:$0xff]  ;;  %v113_v46 = vld [vmem:[#allocation5 + $0xc0] sm:$0xff] }
  0x65   :  { %2077 = vmatpush3.bf16.msra.mxu1 %v2076_v25  ;;  %v143_v41 = vld [vmem:[#allocation5 + $0x1b0] sm:$0xff]  ;;  %v144_v42 = vld [vmem:[#allocation5 + $0x1b8] sm:$0xff]  ;;  %v114_v50 = vld [vmem:[#allocation5 + $0xc8] sm:$0xff]  ;;  %v2052_v51 = vpack.c.bf16 %v96_v40, %v95_v37 }
  0x66   :  { %2079 = vmatprep.subr.bf16.mxu1 %v2078_v34  ;;  %v2082_v43 = vpack.c.bf16 %v144_v42, %v143_v41  ;;  %v127_v44 = vld [vmem:[#allocation5 + $0x130] sm:$0xff]  ;;  %v128_v45 = vld [vmem:[#allocation5 + $0x138] sm:$0xff]  ;;  %v145_v52 = vld [vmem:[#allocation5 + $0x1c0] sm:$0xff]  ;;  %v2054_v55 = vpack.c.bf16 %v114_v50, %v113_v46 }
  0x67   :  { %2049 = vmatpush3.bf16.msra.mxu0 %v2048_v33  ;;  %v146_v53 = vld [vmem:[#allocation5 + $0x1c8] sm:$0xff]  ;;  %v2084_v54 = vpack.c.bf16 %v128_v45, %v127_v44  ;;  %v97_v56 = vld [vmem:[#allocation5 + $0x40] sm:$0xff]  ;;  %v115_v61 = vld [vmem:[#allocation5 + $0xd0] sm:$0xff] }
  0x68   :  { %2051 = vmatprep.subr.bf16.mxu0 %v2050_v39  ;;  %v98_v57 = vld [vmem:[#allocation5 + $0x48] sm:$0xff]  ;;  %v129_v58 = vld [vmem:[#allocation5 + $0x140] sm:$0xff]  ;;  %v2086_v59 = vpack.c.bf16 %v146_v53, %v145_v52  ;;  %v116_v62 = vld [vmem:[#allocation5 + $0xd8] sm:$0xff] }
  0x69   :  { %2081 = vmatpush3.bf16.msra.mxu1 %v2080_v38  ;;  %v130_v60 = vld [vmem:[#allocation5 + $0x148] sm:$0xff]  ;;  %v147_v1 = vld [vmem:[#allocation5 + $0x1d0] sm:$0xff]  ;;  %v148_v2 = vld [vmem:[#allocation5 + $0x1d8] sm:$0xff]  ;;  %v2056_v3 = vpack.c.bf16 %v98_v57, %v97_v56  ;;  %v2058_v5 = vpack.c.bf16 %v116_v62, %v115_v61 }
  0x6a   :  { %2083 = vmatprep.subr.bf16.mxu1 %v2082_v43  ;;  %v2088_v4 = vpack.c.bf16 %v130_v60, %v129_v58  ;;  %v99_v6 = vld [vmem:[#allocation5 + $0x50] sm:$0xff]  ;;  %v100_v7 = vld [vmem:[#allocation5 + $0x58] sm:$0xff]  ;;  %v2090_v9 = vpack.c.bf16 %v148_v2, %v147_v1  ;;  %v117_v11 = vld [vmem:[#allocation5 + $0xe0] sm:$0xff] }
  0x6b   :  { %2053 = vmatpush3.bf16.msra.mxu0 %v2052_v51  ;;  %v131_v8 = vld [vmem:[#allocation5 + $0x150] sm:$0xff]  ;;  %v132_v10 = vld [vmem:[#allocation5 + $0x158] sm:$0xff]  ;;  %v118_v12 = vld [vmem:[#allocation5 + $0xe8] sm:$0xff]  ;;  %v2060_v16 = vpack.c.bf16 %v100_v7, %v99_v6 }
  0x6c   :  { %2055 = vmatprep.subr.bf16.mxu0 %v2054_v55  ;;  %v149_v14 = vld [vmem:[#allocation5 + $0x1e0] sm:$0xff]  ;;  %v150_v15 = vld [vmem:[#allocation5 + $0x1e8] sm:$0xff]  ;;  %v2092_v18 = vpack.c.bf16 %v132_v10, %v131_v8  ;;  %v2062_v19 = vpack.c.bf16 %v118_v12, %v117_v11  ;;  %v83_v22 = vld [vmem:[#allocation2] sm:$0xff] }
  0x6d   :  { %2085 = vmatpush3.bf16.msra.mxu1 %v2084_v54  ;;  %v101_v17 = vld [vmem:[#allocation5 + $0x60] sm:$0xff]  ;;  %v102_v20 = vld [vmem:[#allocation5 + $0x68] sm:$0xff]  ;;  %v2094_v23 = vpack.c.bf16 %v150_v15, %v149_v14  ;;  %v119_v25 = vld [vmem:[#allocation5 + $0xf0] sm:$0xff]  ;;  %v493_v27 = vrot.slane %v83_v22, %v2706_v13  ;;  %v486_v28 = vcombine.high %v83_v22, %v83_v22 }
  0x6e   :  { %2087 = vmatprep.subr.bf16.mxu1 %v2086_v59  ;;  %v133_v21 = vld [vmem:[#allocation5 + $0x160] sm:$0xff]  ;;  %v134_v24 = vld [vmem:[#allocation5 + $0x168] sm:$0xff]  ;;  %v120_v26 = vld [vmem:[#allocation5 + $0xf8] sm:$0xff]  ;;  %v2064_v31 = vpack.c.bf16 %v102_v20, %v101_v17 }
  0x6f   :  { %2057 = vmatpush3.bf16.msra.mxu0 %v2056_v3  ;;  %v151_v29 = vld [vmem:[#allocation5 + $0x1f0] sm:$0xff]  ;;  %v152_v30 = vld [vmem:[#allocation5 + $0x1f8] sm:$0xff]  ;;  %v501_v32 = vcombine.high %v493_v27, %v493_v27  ;;  %v500_v33 = vrot.slane %v486_v28, %v2706_v13  ;;  %v2096_v34 = vpack.c.bf16 %v134_v24, %v133_v21  ;;  %v2066_v35 = vpack.c.bf16 %v120_v26, %v119_v25  ;;  %v169_v41 = vld [vmem:[#allocation5 + $0x280] sm:$0xff] }
  0x70   :  { %2059 = vmatprep.subr.bf16.mxu0 %v2058_v5  ;;  %v103_v36 = vld [vmem:[#allocation5 + $0x70] sm:$0xff]  ;;  %v104_v37 = vld [vmem:[#allocation5 + $0x78] sm:$0xff]  ;;  %v2098_v39 = vpack.c.bf16 %v152_v30, %v151_v29  ;;  %v170_v42 = vld [vmem:[#allocation5 + $0x288] sm:$0xff] }
  0x71   :  { %2089 = vmatpush3.bf16.msra.mxu1 %v2088_v4  ;;  %v135_v38 = vld [vmem:[#allocation5 + $0x170] sm:$0xff]  ;;  %v136_v40 = vld [vmem:[#allocation5 + $0x178] sm:$0xff]  ;;  %676 = vmatprep.mubr.f32.mxu0 %v501_v32  ;;  %v502_v43 = vcombine.high %v500_v33, %v500_v33  ;;  %v201_v44 = vld [vmem:[#allocation5 + $0x380] sm:$0xff]  ;;  %v2068_v46 = vpack.c.bf16 %v104_v37, %v103_v36  ;;  %v2102_v48 = vpack.c.bf16 %v170_v42, %v169_v41 }
  0x72   :  { %2091 = vmatprep.subr.bf16.mxu1 %v2090_v9  ;;  %v202_v45 = vld [vmem:[#allocation5 + $0x388] sm:$0xff]  ;;  %v2100_v47 = vpack.c.bf16 %v136_v40, %v135_v38  ;;  %v153_v49 = vld [vmem:[#allocation5 + $0x200] sm:$0xff]  ;;  %v171_v54 = vld [vmem:[#allocation5 + $0x290] sm:$0xff] }
  0x73   :  { %2061 = vmatpush3.bf16.msra.mxu0 %v2060_v16  ;;  %746 = vmatprep.mubr.f32.mxu1 %v502_v43  ;;  %v154_v50 = vld [vmem:[#allocation5 + $0x208] sm:$0xff]  ;;  %v185_v51 = vld [vmem:[#allocation5 + $0x300] sm:$0xff]  ;;  %v2134_v52 = vpack.c.bf16 %v202_v45, %v201_v44  ;;  %v172_v55 = vld [vmem:[#allocation5 + $0x298] sm:$0xff] }
  0x74   :  { %2063 = vmatprep.subr.bf16.mxu0 %v2062_v19  ;;  %v186_v53 = vld [vmem:[#allocation5 + $0x308] sm:$0xff]  ;;  %v203_v56 = vld [vmem:[#allocation5 + $0x390] sm:$0xff]  ;;  %v204_v57 = vld [vmem:[#allocation5 + $0x398] sm:$0xff]  ;;  %v2104_v58 = vpack.c.bf16 %v154_v50, %v153_v49  ;;  %v2106_v60 = vpack.c.bf16 %v172_v55, %v171_v54 }
  0x75   :  { %2093 = vmatpush3.bf16.msra.mxu1 %v2092_v18  ;;  %v2136_v59 = vpack.c.bf16 %v186_v53, %v185_v51  ;;  %v155_v61 = vld [vmem:[#allocation5 + $0x210] sm:$0xff]  ;;  %v156_v62 = vld [vmem:[#allocation5 + $0x218] sm:$0xff]  ;;  %v2138_v0 = vpack.c.bf16 %v204_v57, %v203_v56  ;;  %v173_v2 = vld [vmem:[#allocation5 + $0x2a0] sm:$0xff] }
  0x76   :  { %2095 = vmatprep.subr.bf16.mxu1 %v2094_v23  ;;  %v187_v63 = vld [vmem:[#allocation5 + $0x310] sm:$0xff]  ;;  %v188_v1 = vld [vmem:[#allocation5 + $0x318] sm:$0xff]  ;;  %v174_v3 = vld [vmem:[#allocation5 + $0x2a8] sm:$0xff]  ;;  %v2108_v6 = vpack.c.bf16 %v156_v62, %v155_v61 }
  0x77   :  { %2065 = vmatpush3.bf16.msra.mxu0 %v2064_v31  ;;  %v205_v4 = vld [vmem:[#allocation5 + $0x3a0] sm:$0xff]  ;;  %v206_v5 = vld [vmem:[#allocation5 + $0x3a8] sm:$0xff]  ;;  %v2140_v7 = vpack.c.bf16 %v188_v1, %v187_v63  ;;  %v2110_v8 = vpack.c.bf16 %v174_v3, %v173_v2  ;;  %v175_v15 = vld [vmem:[#allocation5 + $0x2b0] sm:$0xff] }
  0x78   :  { %2067 = vmatprep.subr.bf16.mxu0 %v2066_v35  ;;  %v157_v9 = vld [vmem:[#allocation5 + $0x220] sm:$0xff]  ;;  %v158_v10 = vld [vmem:[#allocation5 + $0x228] sm:$0xff]  ;;  %v2142_v12 = vpack.c.bf16 %v206_v5, %v205_v4  ;;  %v176_v16 = vld [vmem:[#allocation5 + $0x2b8] sm:$0xff] }
  0x79   :  { %2097 = vmatpush3.bf16.msra.mxu1 %v2096_v34  ;;  %v189_v11 = vld [vmem:[#allocation5 + $0x320] sm:$0xff]  ;;  %v190_v14 = vld [vmem:[#allocation5 + $0x328] sm:$0xff]  ;;  %v207_v17 = vld [vmem:[#allocation5 + $0x3b0] sm:$0xff]  ;;  %v2112_v19 = vpack.c.bf16 %v158_v10, %v157_v9  ;;  %v2114_v21 = vpack.c.bf16 %v176_v16, %v175_v15 }
  0x7a   :  { %2099 = vmatprep.subr.bf16.mxu1 %v2098_v39  ;;  %v208_v18 = vld [vmem:[#allocation5 + $0x3b8] sm:$0xff]  ;;  %v2144_v20 = vpack.c.bf16 %v190_v14, %v189_v11  ;;  %v159_v22 = vld [vmem:[#allocation5 + $0x230] sm:$0xff]  ;;  %v178_v28 = vld [vmem:[#allocation5 + $0x2c8] sm:$0xff] }
  0x7b   :  { %2069 = vmatpush3.bf16.msra.mxu0 %v2068_v46  ;;  %v160_v23 = vld [vmem:[#allocation5 + $0x238] sm:$0xff]  ;;  %v191_v24 = vld [vmem:[#allocation5 + $0x330] sm:$0xff]  ;;  %v2146_v25 = vpack.c.bf16 %v208_v18, %v207_v17  ;;  %v209_v29 = vld [vmem:[#allocation5 + $0x3c0] sm:$0xff] }
  0x7c   :  { %2103 = vmatprep.subr.bf16.mxu0 %v2102_v48  ;;  %v192_v26 = vld [vmem:[#allocation5 + $0x338] sm:$0xff]  ;;  %v210_v30 = vld [vmem:[#allocation5 + $0x3c8] sm:$0xff]  ;;  %v2116_v32 = vpack.c.bf16 %v160_v23, %v159_v22  ;;  %v161_v37 = vld [vmem:[#allocation5 + $0x240] sm:$0xff] }
  0x7d   :  { %2101 = vmatpush3.bf16.msra.mxu1 %v2100_v47  ;;  %v84_v31 = vld [vmem:[#allocation2 + $0x8] sm:$0xff]  ;;  %v2148_v35 = vpack.c.bf16 %v192_v26, %v191_v24  ;;  %v162_v38 = vld [vmem:[#allocation5 + $0x248] sm:$0xff]  ;;  %v193_v39 = vld [vmem:[#allocation5 + $0x340] sm:$0xff]  ;;  %v2150_v40 = vpack.c.bf16 %v210_v30, %v209_v29 }
  0x7e   :  { %2135 = vmatprep.subr.bf16.mxu1 %v2134_v52  ;;  %677 = vmatmul.mubr.f32.vlgmr.msra.gmra.mrb[0].mxu0 %v493_v27  ;;  %v177_v27 = vld [vmem:[#allocation5 + $0x2c0] sm:$0xff]  ;;  %v503_v34 = vcombine.high %v84_v31, %v84_v31  ;;  %v194_v41 = vld [vmem:[#allocation5 + $0x348] sm:$0xff]  ;;  %v179_v42 = vld [vmem:[#allocation5 + $0x2d0] sm:$0xff]  ;;  %v2120_v48 = vpack.c.bf16 %v162_v38, %v161_v37 }
  0x7f   :  { %2105 = vmatpush3.bf16.msra.mxu0 %v2104_v58  ;;  %v2118_v36 = vpack.c.bf16 %v178_v28, %v177_v27  ;;  %v180_v43 = vld [vmem:[#allocation5 + $0x2d8] sm:$0xff]  ;;  %v211_v46 = vld [vmem:[#allocation5 + $0x3d0] sm:$0xff]  ;;  %v2152_v50 = vpack.c.bf16 %v194_v41, %v193_v39  ;;  %v181_v57 = vld [vmem:[#allocation5 + $0x2e0] sm:$0xff] }
  0x80   :  { %747 = vmatmul.mubr.f32.vlgmr.msra.gmra.mrb[0].mxu1 %v500_v33  ;;  %2107 = vmatprep.subr.bf16.mxu0 %v2106_v60  ;;  %v2711_v33 = vrot.slane %v84_v31, %v2706_v13  ;;  %v2716_v45 = vrot.slane %v503_v34, %v2706_v13  ;;  %v212_v47 = vld [vmem:[#allocation5 + $0x3d8] sm:$0xff]  ;;  %v2122_v51 = vpack.c.bf16 %v180_v43, %v179_v42  ;;  %v163_v52 = vld [vmem:[#allocation5 + $0x250] sm:$0xff]  ;;  %v182_v58 = vld [vmem:[#allocation5 + $0x2e8] sm:$0xff] }
  0x81   :  { %2137 = vmatpush3.bf16.msra.mxu1 %v2136_v59  ;;  %v164_v53 = vld [vmem:[#allocation5 + $0x258] sm:$0xff]  ;;  %v195_v54 = vld [vmem:[#allocation5 + $0x350] sm:$0xff]  ;;  %v2154_v55 = vpack.c.bf16 %v212_v47, %v211_v46  ;;  %v213_v59 = vld [vmem:[#allocation5 + $0x3e0] sm:$0xff]  ;;  %v2126_v63 = vpack.c.bf16 %v182_v58, %v181_v57 }
  0x82   :  { %2139 = vmatprep.subr.bf16.mxu1 %v2138_v0  ;;  %v518_v44 = vcombine.high %v2711_v33, %v2711_v33  ;;  %v519_v49 = vcombine.high %v2716_v45, %v2716_v45  ;;  %v196_v56 = vld [vmem:[#allocation5 + $0x358] sm:$0xff]  ;;  %v214_v60 = vld [vmem:[#allocation5 + $0x3e8] sm:$0xff]  ;;  %v2124_v61 = vpack.c.bf16 %v164_v53, %v163_v52  ;;  %v165_v0 = vld [vmem:[#allocation5 + $0x260] sm:$0xff] }
  0x83   :  { %2109 = vmatpush3.bf16.msra.mxu0 %v2108_v6  ;;  %v2156_v62 = vpack.c.bf16 %v196_v56, %v195_v54  ;;  %v166_v1 = vld [vmem:[#allocation5 + $0x268] sm:$0xff]  ;;  %v197_v2 = vld [vmem:[#allocation5 + $0x360] sm:$0xff]  ;;  %v2158_v3 = vpack.c.bf16 %v214_v60, %v213_v59  ;;  %v183_v5 = vld [vmem:[#allocation5 + $0x2f0] sm:$0xff] }
  0x84   :  { %2111 = vmatprep.subr.bf16.mxu0 %v2110_v8  ;;  %816 = vmatprep.mubr.f32.mxu0 %v518_v44  ;;  %v198_v4 = vld [vmem:[#allocation5 + $0x368] sm:$0xff]  ;;  %v184_v6 = vld [vmem:[#allocation5 + $0x2f8] sm:$0xff]  ;;  %v2128_v9 = vpack.c.bf16 %v166_v1, %v165_v0  ;;  %v199_v15 = vld [vmem:[#allocation5 + $0x370] sm:$0xff] }
  0x85   :  { %2141 = vmatpush3.bf16.msra.mxu1 %v2140_v7  ;;  %886 = vmatprep.mubr.f32.mxu1 %v519_v49  ;;  %v215_v7 = vld [vmem:[#allocation5 + $0x3f0] sm:$0xff]  ;;  %v216_v8 = vld [vmem:[#allocation5 + $0x3f8] sm:$0xff]  ;;  %v2160_v10 = vpack.c.bf16 %v198_v4, %v197_v2  ;;  %v2130_v11 = vpack.c.bf16 %v184_v6, %v183_v5  ;;  %v233_v18 = vld [vmem:[#allocation5 + $0x480] sm:$0xff] }
  0x86   :  { %2143 = vmatprep.subr.bf16.mxu1 %v2142_v12  ;;  %v167_v12 = vld [vmem:[#allocation5 + $0x270] sm:$0xff]  ;;  %v168_v14 = vld [vmem:[#allocation5 + $0x278] sm:$0xff]  ;;  %v2162_v16 = vpack.c.bf16 %v216_v8, %v215_v7  ;;  %v217_v23 = vld [vmem:[#allocation5 + $0x400] sm:$0xff] }
  0x87   :  { %2113 = vmatpush3.bf16.msra.mxu0 %v2112_v19  ;;  %v200_v17 = vld [vmem:[#allocation5 + $0x378] sm:$0xff]  ;;  %v234_v19 = vld [vmem:[#allocation5 + $0x488] sm:$0xff]  ;;  %v2132_v22 = vpack.c.bf16 %v168_v14, %v167_v12  ;;  %v249_v27 = vld [vmem:[#allocation5 + $0x500] sm:$0xff] }
  0x88   :  { %2115 = vmatprep.subr.bf16.mxu0 %v2114_v21  ;;  %v266_v21 = vld [vmem:[#allocation5 + $0x588] sm:$0xff]  ;;  %v2164_v24 = vpack.c.bf16 %v200_v17, %v199_v15  ;;  %v235_v30 = vld [vmem:[#allocation5 + $0x490] sm:$0xff]  ;;  %v236_v31 = vld [vmem:[#allocation5 + $0x498] sm:$0xff] }
  0x89   :  { %2145 = vmatpush3.bf16.msra.mxu1 %v2144_v20  ;;  %v265_v20 = vld [vmem:[#allocation5 + $0x580] sm:$0xff]  ;;  %v218_v26 = vld [vmem:[#allocation5 + $0x408] sm:$0xff]  ;;  %v268_v34 = vld [vmem:[#allocation5 + $0x598] sm:$0xff]  ;;  %v2170_v38 = vpack.c.bf16 %v236_v31, %v235_v30 }
  0x8a   :  { %2147 = vmatprep.subr.bf16.mxu1 %v2146_v25  ;;  %v2166_v25 = vpack.c.bf16 %v234_v19, %v233_v18  ;;  %v250_v28 = vld [vmem:[#allocation5 + $0x508] sm:$0xff]  ;;  %v2198_v29 = vpack.c.bf16 %v266_v21, %v265_v20  ;;  %v85_v37 = vld [vmem:[#allocation2 + $0x10] sm:$0xff]  ;;  %v219_v39 = vld [vmem:[#allocation5 + $0x410] sm:$0xff] }
  0x8b   :  { %2117 = vmatpush3.bf16.msra.mxu0 %v2116_v32  ;;  %v267_v32 = vld [vmem:[#allocation5 + $0x590] sm:$0xff]  ;;  %v2721_v42 = vrot.slane %v85_v37, %v2706_v13  ;;  %v520_v43 = vcombine.high %v85_v37, %v85_v37  ;;  %v252_v46 = vld [vmem:[#allocation5 + $0x518] sm:$0xff]  ;;  %v237_v47 = vld [vmem:[#allocation5 + $0x4a0] sm:$0xff] }
  0x8c   :  { %2119 = vmatprep.subr.bf16.mxu0 %v2118_v36  ;;  %v2200_v36 = vpack.c.bf16 %v250_v28, %v249_v27  ;;  %v251_v41 = vld [vmem:[#allocation5 + $0x510] sm:$0xff]  ;;  %v2202_v44 = vpack.c.bf16 %v268_v34, %v267_v32  ;;  %v269_v49 = vld [vmem:[#allocation5 + $0x5a0] sm:$0xff]  ;;  %v222_v57 = vld [vmem:[#allocation5 + $0x428] sm:$0xff] }
  0x8d   :  { %2149 = vmatpush3.bf16.msra.mxu1 %v2148_v35  ;;  %v2168_v35 = vpack.c.bf16 %v218_v26, %v217_v23  ;;  %v2727_v52 = vrot.slane %v520_v43, %v2706_v13  ;;  %v2204_v54 = vpack.c.bf16 %v252_v46, %v251_v41  ;;  %v221_v56 = vld [vmem:[#allocation5 + $0x420] sm:$0xff]  ;;  %v254_v60 = vld [vmem:[#allocation5 + $0x528] sm:$0xff]  ;;  %v272_v0 = vld [vmem:[#allocation5 + $0x5b8] sm:$0xff] }
  0x8e   :  { %2151 = vmatprep.subr.bf16.mxu1 %v2150_v40  ;;  %v220_v40 = vld [vmem:[#allocation5 + $0x418] sm:$0xff]  ;;  %v253_v58 = vld [vmem:[#allocation5 + $0x520] sm:$0xff]  ;;  %v255_v5 = vld [vmem:[#allocation5 + $0x530] sm:$0xff] }
  0x8f   :  { %2121 = vmatpush3.bf16.msra.mxu0 %v2120_v48  ;;  %v238_v48 = vld [vmem:[#allocation5 + $0x4a8] sm:$0xff]  ;;  %v2172_v53 = vpack.c.bf16 %v220_v40, %v219_v39  ;;  %v2208_v1 = vpack.c.bf16 %v254_v60, %v253_v58  ;;  %v224_v4 = vld [vmem:[#allocation5 + $0x438] sm:$0xff]  ;;  %v241_v8 = vld [vmem:[#allocation5 + $0x4c0] sm:$0xff] }
  0x90   :  { %2123 = vmatprep.subr.bf16.mxu0 %v2122_v51  ;;  %v535_v51 = vcombine.high %v2721_v42, %v2721_v42  ;;  %v256_v7 = vld [vmem:[#allocation5 + $0x538] sm:$0xff]  ;;  %v226_v17 = vld [vmem:[#allocation5 + $0x448] sm:$0xff]  ;;  %v257_v18 = vld [vmem:[#allocation5 + $0x540] sm:$0xff] }
  0x91   :  { %2153 = vmatpush3.bf16.msra.mxu1 %v2152_v50  ;;  %v270_v50 = vld [vmem:[#allocation5 + $0x5a8] sm:$0xff]  ;;  %v2212_v14 = vpack.c.bf16 %v256_v7, %v255_v5  ;;  %v243_v21 = vld [vmem:[#allocation5 + $0x4d0] sm:$0xff]  ;;  %v260_v32 = vld [vmem:[#allocation5 + $0x558] sm:$0xff] }
  0x92   :  { %2155 = vmatprep.subr.bf16.mxu1 %v2154_v55  ;;  %v2174_v55 = vpack.c.bf16 %v238_v48, %v237_v47  ;;  %v2206_v59 = vpack.c.bf16 %v270_v50, %v269_v49  ;;  %v258_v20 = vld [vmem:[#allocation5 + $0x548] sm:$0xff]  ;;  %v275_v23 = vld [vmem:[#allocation5 + $0x5d0] sm:$0xff]  ;;  %v245_v34 = vld [vmem:[#allocation5 + $0x4e0] sm:$0xff] }
  0x93   :  { %2125 = vmatpush3.bf16.msra.mxu0 %v2124_v61  ;;  %v239_v61 = vld [vmem:[#allocation5 + $0x4b0] sm:$0xff]  ;;  %v2216_v26 = vpack.c.bf16 %v258_v20, %v257_v18  ;;  %v278_v37 = vld [vmem:[#allocation5 + $0x5e8] sm:$0xff]  ;;  %v229_v41 = vld [vmem:[#allocation5 + $0x460] sm:$0xff] }
  0x94   :  { %2127 = vmatprep.subr.bf16.mxu0 %v2126_v63  ;;  %v271_v63 = vld [vmem:[#allocation5 + $0x5b0] sm:$0xff]  ;;  %v230_v43 = vld [vmem:[#allocation5 + $0x468] sm:$0xff]  ;;  %v248_v49 = vld [vmem:[#allocation5 + $0x4f8] sm:$0xff] }
  0x95   :  { %2157 = vmatpush3.bf16.msra.mxu1 %v2156_v62  ;;  %v240_v62 = vld [vmem:[#allocation5 + $0x4b8] sm:$0xff]  ;;  %v2210_v6 = vpack.c.bf16 %v272_v0, %v271_v63  ;;  %v227_v28 = vld [vmem:[#allocation5 + $0x450] sm:$0xff]  ;;  %v262_v47 = vld [vmem:[#allocation5 + $0x568] sm:$0xff] }
  0x96   :  { %2159 = vmatprep.subr.bf16.mxu1 %v2158_v3  ;;  %v2178_v2 = vpack.c.bf16 %v240_v62, %v239_v61  ;;  %v223_v3 = vld [vmem:[#allocation5 + $0x430] sm:$0xff]  ;;  %v232_v58 = vld [vmem:[#allocation5 + $0x478] sm:$0xff]  ;;  %v297_v61 = vld [vmem:[#allocation5 + $0x680] sm:$0xff] }
  0x97   :  { %2129 = vmatpush3.bf16.msra.mxu0 %v2128_v9  ;;  %v242_v9 = vld [vmem:[#allocation5 + $0x4c8] sm:$0xff]  ;;  %v2180_v12 = vpack.c.bf16 %v224_v4, %v223_v3  ;;  %v259_v30 = vld [vmem:[#allocation5 + $0x550] sm:$0xff]  ;;  %v264_v60 = vld [vmem:[#allocation5 + $0x578] sm:$0xff] }
  0x98   :  { %2131 = vmatprep.subr.bf16.mxu0 %v2130_v11  ;;  %v274_v11 = vld [vmem:[#allocation5 + $0x5c8] sm:$0xff]  ;;  %v2182_v15 = vpack.c.bf16 %v242_v9, %v241_v8  ;;  %v2220_v39 = vpack.c.bf16 %v260_v32, %v259_v30  ;;  %v247_v48 = vld [vmem:[#allocation5 + $0x4f0] sm:$0xff]  ;;  %v329_v63 = vld [vmem:[#allocation5 + $0x780] sm:$0xff] }
  0x99   :  { %2161 = vmatpush3.bf16.msra.mxu1 %v2160_v10  ;;  %v273_v10 = vld [vmem:[#allocation5 + $0x5c0] sm:$0xff]  ;;  %v279_v50 = vld [vmem:[#allocation5 + $0x5f0] sm:$0xff]  ;;  %v298_v62 = vld [vmem:[#allocation5 + $0x688] sm:$0xff] }
  0x9a   :  { %2163 = vmatprep.subr.bf16.mxu1 %v2162_v16  ;;  %v225_v16 = vld [vmem:[#allocation5 + $0x440] sm:$0xff]  ;;  %v2214_v19 = vpack.c.bf16 %v274_v11, %v273_v10  ;;  %v330_v0 = vld [vmem:[#allocation5 + $0x788] sm:$0xff]  ;;  %v2230_v3 = vpack.c.bf16 %v298_v62, %v297_v61  ;;  %v299_v9 = vld [vmem:[#allocation5 + $0x690] sm:$0xff] }
  0x9b   :  { %2133 = vmatpush3.bf16.msra.mxu0 %v2132_v22  ;;  %v244_v22 = vld [vmem:[#allocation5 + $0x4d8] sm:$0xff]  ;;  %v281_v4 = vld [vmem:[#allocation5 + $0x600] sm:$0xff]  ;;  %v282_v5 = vld [vmem:[#allocation5 + $0x608] sm:$0xff]  ;;  %v2262_v7 = vpack.c.bf16 %v330_v0, %v329_v63 }
  0x9c   :  { %2167 = vmatprep.subr.bf16.mxu0 %v2166_v25  ;;  %v2184_v25 = vpack.c.bf16 %v226_v17, %v225_v16  ;;  %v2186_v27 = vpack.c.bf16 %v244_v22, %v243_v21  ;;  %v314_v8 = vld [vmem:[#allocation5 + $0x708] sm:$0xff]  ;;  %v300_v10 = vld [vmem:[#allocation5 + $0x698] sm:$0xff]  ;;  %v2232_v16 = vpack.c.bf16 %v282_v5, %v281_v4  ;;  %v315_v21 = vld [vmem:[#allocation5 + $0x710] sm:$0xff] }
  0x9d   :  { %2165 = vmatpush3.bf16.msra.mxu1 %v2164_v24  ;;  %v276_v24 = vld [vmem:[#allocation5 + $0x5d8] sm:$0xff]  ;;  %v2234_v18 = vpack.c.bf16 %v300_v10, %v299_v9  ;;  %v322_v62 = vld [vmem:[#allocation5 + $0x748] sm:$0xff]  ;;  %v307_v63 = vld [vmem:[#allocation5 + $0x6d0] sm:$0xff] }
  0x9e   :  { %2199 = vmatprep.subr.bf16.mxu1 %v2198_v29  ;;  %817 = vmatmul.mubr.f32.vlgmr.msra.gmra.mrb[2].mxu0 %v2711_v33  ;;  %v536_v33 = vcombine.high %v2727_v52, %v2727_v52  ;;  %v228_v29 = vld [vmem:[#allocation5 + $0x458] sm:$0xff]  ;;  %v2218_v31 = vpack.c.bf16 %v276_v24, %v275_v23  ;;  %v301_v24 = vld [vmem:[#allocation5 + $0x6a0] sm:$0xff]  ;;  %v291_v5 = vld [vmem:[#allocation5 + $0x650] sm:$0xff] }
  0x9f   :  { %2169 = vmatpush3.bf16.msra.mxu0 %v2168_v35  ;;  %956 = vmatprep.mubr.f32.mxu0 %v535_v51  ;;  %v246_v35 = vld [vmem:[#allocation5 + $0x4e8] sm:$0xff]  ;;  %v280_v51 = vld [vmem:[#allocation5 + $0x5f8] sm:$0xff]  ;;  %v309_v10 = vld [vmem:[#allocation5 + $0x6e0] sm:$0xff] }
  0xa0   :  { %887 = vmatmul.mubr.f32.vlgmr.msra.gmra.mrb[2].mxu1 %v2716_v45  ;;  %2171 = vmatprep.subr.bf16.mxu0 %v2170_v38  ;;  %v2176_v45 = vpack.c.bf16 %v222_v57, %v221_v56  ;;  %v2188_v38 = vpack.c.bf16 %v228_v29, %v227_v28  ;;  %v2190_v40 = vpack.c.bf16 %v246_v35, %v245_v34  ;;  %v231_v57 = vld [vmem:[#allocation5 + $0x470] sm:$0xff]  ;;  %v284_v20 = vld [vmem:[#allocation5 + $0x618] sm:$0xff]  ;;  %v334_v28 = vld [vmem:[#allocation5 + $0x7a8] sm:$0xff] }
  0xa1   :  { %2201 = vmatpush3.bf16.msra.mxu1 %v2200_v36  ;;  %1026 = vmatprep.mubr.f32.mxu1 %v536_v33  ;;  %v277_v36 = vld [vmem:[#allocation5 + $0x5e0] sm:$0xff]  ;;  %v2194_v56 = vpack.c.bf16 %v248_v49, %v247_v48  ;;  %v263_v33 = vld [vmem:[#allocation5 + $0x570] sm:$0xff]  ;;  %v316_v23 = vld [vmem:[#allocation5 + $0x718] sm:$0xff] }
  0xa2   :  { %2203 = vmatprep.subr.bf16.mxu1 %v2202_v44  ;;  %v261_v44 = vld [vmem:[#allocation5 + $0x560] sm:$0xff]  ;;  %v2222_v46 = vpack.c.bf16 %v278_v37, %v277_v36  ;;  %v286_v35 = vld [vmem:[#allocation5 + $0x628] sm:$0xff]  ;;  %v319_v48 = vld [vmem:[#allocation5 + $0x730] sm:$0xff] }
  0xa3   :  { %2173 = vmatpush3.bf16.msra.mxu0 %v2172_v53  ;;  %v2192_v53 = vpack.c.bf16 %v230_v43, %v229_v41  ;;  %v285_v34 = vld [vmem:[#allocation5 + $0x620] sm:$0xff]  ;;  %v336_v41 = vld [vmem:[#allocation5 + $0x7b8] sm:$0xff] }
  0xa4   :  { %2175 = vmatprep.subr.bf16.mxu0 %v2174_v55  ;;  %v2224_v55 = vpack.c.bf16 %v262_v47, %v261_v44  ;;  %v317_v36 = vld [vmem:[#allocation5 + $0x720] sm:$0xff]  ;;  %v2240_v43 = vpack.c.bf16 %v286_v35, %v285_v34  ;;  %v288_v47 = vld [vmem:[#allocation5 + $0x638] sm:$0xff]  ;;  %v295_v34 = vld [vmem:[#allocation5 + $0x670] sm:$0xff] }
  0xa5   :  { %2205 = vmatpush3.bf16.msra.mxu1 %v2204_v54  ;;  %v86_v54 = vld [vmem:[#allocation2 + $0x18] sm:$0xff]  ;;  %v308_v0 = vld [vmem:[#allocation5 + $0x6d8] sm:$0xff] }
  0xa6   :  { %2207 = vmatprep.subr.bf16.mxu1 %v2206_v59  ;;  %v2226_v59 = vpack.c.bf16 %v280_v51, %v279_v50  ;;  %v2733_v11 = vrot.slane %v86_v54, %v2706_v13  ;;  %v320_v50 = vld [vmem:[#allocation5 + $0x738] sm:$0xff]  ;;  %v305_v51 = vld [vmem:[#allocation5 + $0x6c0] sm:$0xff]  ;;  %v2250_v4 = vpack.c.bf16 %v308_v0, %v307_v63  ;;  %v379_v63 = vld [vmem:[#allocation5 + $0x910] sm:$0xff] }
  0xa7   :  { %2177 = vmatpush3.bf16.msra.mxu0 %v2176_v45  ;;  %v537_v45 = vcombine.high %v86_v54, %v86_v54  ;;  %v337_v54 = vld [vmem:[#allocation5 + $0x7c0] sm:$0xff]  ;;  %v324_v9 = vld [vmem:[#allocation5 + $0x758] sm:$0xff] }
  0xa8   :  { %2179 = vmatprep.subr.bf16.mxu0 %v2178_v2  ;;  %v2228_v2 = vpack.c.bf16 %v264_v60, %v263_v33  ;;  %v289_v33 = vld [vmem:[#allocation5 + $0x640] sm:$0xff]  ;;  %v296_v35 = vld [vmem:[#allocation5 + $0x678] sm:$0xff] }
  0xa9   :  { %2209 = vmatpush3.bf16.msra.mxu1 %v2208_v1  ;;  %v2196_v1 = vpack.c.bf16 %v232_v58, %v231_v57  ;;  %v2276_v57 = vpack.c.bf16 %v320_v50, %v319_v48  ;;  %v321_v60 = vld [vmem:[#allocation5 + $0x740] sm:$0xff]  ;;  %v346_v48 = vld [vmem:[#allocation5 + $0x808] sm:$0xff] }
  0xaa   :  { %2211 = vmatprep.subr.bf16.mxu1 %v2210_v6  ;;  %v313_v6 = vld [vmem:[#allocation5 + $0x700] sm:$0xff] }
  0xab   :  { %2181 = vmatpush3.bf16.msra.mxu0 %v2180_v12  ;;  %v331_v12 = vld [vmem:[#allocation5 + $0x790] sm:$0xff]  ;;  %v2264_v17 = vpack.c.bf16 %v314_v8, %v313_v6  ;;  %v292_v6 = vld [vmem:[#allocation5 + $0x658] sm:$0xff] }
  0xac   :  { %2183 = vmatprep.subr.bf16.mxu0 %v2182_v15  ;;  %v2736_v15 = vrot.slane %v537_v45, %v2706_v13  ;;  %v339_v45 = vld [vmem:[#allocation5 + $0x7d0] sm:$0xff] }
  0xad   :  { %2213 = vmatpush3.bf16.msra.mxu1 %v2212_v14  ;;  %v332_v14 = vld [vmem:[#allocation5 + $0x798] sm:$0xff] }
  0xae   :  { %2215 = vmatprep.subr.bf16.mxu1 %v2214_v19  ;;  %v283_v19 = vld [vmem:[#allocation5 + $0x610] sm:$0xff]  ;;  %v2266_v22 = vpack.c.bf16 %v332_v14, %v331_v12  ;;  %v553_v29 = vcombine.high %v2736_v15, %v2736_v15  ;;  %v310_v12 = vld [vmem:[#allocation5 + $0x6e8] sm:$0xff]  ;;  %v341_v14 = vld [vmem:[#allocation5 + $0x7e0] sm:$0xff] }
  0xaf   :  { %2185 = vmatpush3.bf16.msra.mxu0 %v2184_v25  ;;  %v302_v25 = vld [vmem:[#allocation5 + $0x6a8] sm:$0xff]  ;;  %v2236_v30 = vpack.c.bf16 %v284_v20, %v283_v19  ;;  %v2254_v19 = vpack.c.bf16 %v310_v12, %v309_v10  ;;  %v293_v20 = vld [vmem:[#allocation5 + $0x660] sm:$0xff] }
  0xb0   :  { %2187 = vmatprep.subr.bf16.mxu0 %v2186_v27  ;;  %v333_v27 = vld [vmem:[#allocation5 + $0x7a0] sm:$0xff]  ;;  %v2238_v32 = vpack.c.bf16 %v302_v25, %v301_v24  ;;  %v326_v24 = vld [vmem:[#allocation5 + $0x768] sm:$0xff]  ;;  %v311_v25 = vld [vmem:[#allocation5 + $0x6f0] sm:$0xff] }
  0xb1   :  { %2217 = vmatpush3.bf16.msra.mxu1 %v2216_v26  ;;  %v552_v26 = vcombine.high %v2733_v11, %v2733_v11  ;;  %v2270_v37 = vpack.c.bf16 %v334_v28, %v333_v27  ;;  %v343_v27 = vld [vmem:[#allocation5 + $0x7f0] sm:$0xff]  ;;  %v344_v28 = vld [vmem:[#allocation5 + $0x7f8] sm:$0xff]  ;;  %v349_v10 = vld [vmem:[#allocation5 + $0x820] sm:$0xff] }
  0xb2   :  { %2219 = vmatprep.subr.bf16.mxu1 %v2218_v31  ;;  %v2268_v31 = vpack.c.bf16 %v316_v23, %v315_v21  ;;  %v294_v21 = vld [vmem:[#allocation5 + $0x668] sm:$0xff] }
  0xb3   :  { %2189 = vmatpush3.bf16.msra.mxu0 %v2188_v38  ;;  %v318_v38 = vld [vmem:[#allocation5 + $0x728] sm:$0xff] }
  0xb4   :  { %2191 = vmatprep.subr.bf16.mxu0 %v2190_v40  ;;  %v335_v40 = vld [vmem:[#allocation5 + $0x7b0] sm:$0xff]  ;;  %v350_v12 = vld [vmem:[#allocation5 + $0x828] sm:$0xff] }
  0xb5   :  { %2221 = vmatpush3.bf16.msra.mxu1 %v2220_v39  ;;  %v304_v39 = vld [vmem:[#allocation5 + $0x6b8] sm:$0xff]  ;;  %v2274_v49 = vpack.c.bf16 %v336_v41, %v335_v40  ;;  %v393_v40 = vld [vmem:[#allocation5 + $0x980] sm:$0xff]  ;;  %v394_v41 = vld [vmem:[#allocation5 + $0x988] sm:$0xff] }
  0xb6   :  { %2223 = vmatprep.subr.bf16.mxu1 %v2222_v46  ;;  %v287_v46 = vld [vmem:[#allocation5 + $0x630] sm:$0xff]  ;;  %v2326_v50 = vpack.c.bf16 %v394_v41, %v393_v40  ;;  %v372_v41 = vld [vmem:[#allocation5 + $0x8d8] sm:$0xff] }
  0xb7   :  { %2193 = vmatpush3.bf16.msra.mxu0 %v2192_v53  ;;  %v306_v53 = vld [vmem:[#allocation5 + $0x6c8] sm:$0xff]  ;;  %v371_v40 = vld [vmem:[#allocation5 + $0x8d0] sm:$0xff] }
  0xb8   :  { %2195 = vmatprep.subr.bf16.mxu0 %v2194_v56  ;;  %v2244_v56 = vpack.c.bf16 %v288_v47, %v287_v46  ;;  %v2246_v58 = vpack.c.bf16 %v306_v53, %v305_v51  ;;  %v345_v47 = vld [vmem:[#allocation5 + $0x800] sm:$0xff]  ;;  %v378_v51 = vld [vmem:[#allocation5 + $0x908] sm:$0xff]  ;;  %v363_v53 = vld [vmem:[#allocation5 + $0x890] sm:$0xff] }
  0xb9   :  { %2225 = vmatpush3.bf16.msra.mxu1 %v2224_v55  ;;  %v338_v55 = vld [vmem:[#allocation5 + $0x7c8] sm:$0xff] }
  0xba   :  { %2227 = vmatprep.subr.bf16.mxu1 %v2226_v59  ;;  %v290_v59 = vld [vmem:[#allocation5 + $0x648] sm:$0xff]  ;;  %v2278_v61 = vpack.c.bf16 %v338_v55, %v337_v54  ;;  %v364_v54 = vld [vmem:[#allocation5 + $0x898] sm:$0xff] }
  0xbb   :  { %2197 = vmatpush3.bf16.msra.mxu0 %v2196_v1  ;;  %v340_v1 = vld [vmem:[#allocation5 + $0x7d8] sm:$0xff] }
  0xbc   :  { %2231 = vmatprep.subr.bf16.mxu0 %v2230_v3  ;;  %v2280_v3 = vpack.c.bf16 %v322_v62, %v321_v60  ;;  %v2282_v8 = vpack.c.bf16 %v340_v1, %v339_v45  ;;  %v2298_v60 = vpack.c.bf16 %v364_v54, %v363_v53  ;;  %v348_v62 = vld [vmem:[#allocation5 + $0x818] sm:$0xff]  ;;  %v365_v1 = vld [vmem:[#allocation5 + $0x8a0] sm:$0xff] }
  0xbd   :  { %2229 = vmatpush3.bf16.msra.mxu1 %v2228_v2  ;;  %v2248_v2 = vpack.c.bf16 %v290_v59, %v289_v33  ;;  %v2296_v33 = vpack.c.bf16 %v346_v48, %v345_v47  ;;  %v380_v45 = vld [vmem:[#allocation5 + $0x918] sm:$0xff]  ;;  %v2314_v47 = vpack.c.bf16 %v372_v41, %v371_v40  ;;  %v355_v48 = vld [vmem:[#allocation5 + $0x850] sm:$0xff]  ;;  %v373_v54 = vld [vmem:[#allocation5 + $0x8e0] sm:$0xff] }
  0xbe   :  { %2263 = vmatprep.subr.bf16.mxu1 %v2262_v7  ;;  %957 = vmatmul.mubr.f32.vlgmr.msra.gmra.mrb[4].mxu0 %v2721_v42  ;;  %v303_v42 = vld [vmem:[#allocation5 + $0x6b0] sm:$0xff]  ;;  %v388_v53 = vld [vmem:[#allocation5 + $0x958] sm:$0xff] }
  0xbf   :  { %2233 = vmatpush3.bf16.msra.mxu0 %v2232_v16  ;;  %1096 = vmatprep.mubr.f32.mxu0 %v552_v26  ;;  %v2242_v44 = vpack.c.bf16 %v304_v39, %v303_v42  ;;  %v323_v7 = vld [vmem:[#allocation5 + $0x750] sm:$0xff]  ;;  %v342_v16 = vld [vmem:[#allocation5 + $0x7e8] sm:$0xff]  ;;  %v312_v26 = vld [vmem:[#allocation5 + $0x6f8] sm:$0xff] }
  0xc0   :  { %1027 = vmatmul.mubr.f32.vlgmr.msra.gmra.mrb[4].mxu1 %v2727_v52  ;;  %2235 = vmatprep.subr.bf16.mxu0 %v2234_v18  ;;  %v2272_v52 = vpack.c.bf16 %v318_v38, %v317_v36  ;;  %v2284_v18 = vpack.c.bf16 %v324_v9, %v323_v7  ;;  %v2286_v23 = vpack.c.bf16 %v342_v16, %v341_v14  ;;  %v327_v36 = vld [vmem:[#allocation5 + $0x770] sm:$0xff]  ;;  %v328_v38 = vld [vmem:[#allocation5 + $0x778] sm:$0xff]  ;;  %v361_v42 = vld [vmem:[#allocation5 + $0x880] sm:$0xff] }
  0xc1   :  { %2265 = vmatpush3.bf16.msra.mxu1 %v2264_v17  ;;  %1166 = vmatprep.mubr.f32.mxu1 %v553_v29  ;;  %v2252_v17 = vpack.c.bf16 %v292_v6, %v291_v5  ;;  %v2256_v29 = vpack.c.bf16 %v294_v21, %v293_v20  ;;  %v362_v39 = vld [vmem:[#allocation5 + $0x888] sm:$0xff]  ;;  %v381_v14 = vld [vmem:[#allocation5 + $0x920] sm:$0xff]  ;;  %v400_v20 = vld [vmem:[#allocation5 + $0x9b8] sm:$0xff]  ;;  %v2304_v21 = vpack.c.bf16 %v350_v12, %v349_v10 }
  0xc2   :  { %2267 = vmatprep.subr.bf16.mxu1 %v2266_v22  ;;  %v325_v22 = vld [vmem:[#allocation5 + $0x760] sm:$0xff]  ;;  %v2294_v46 = vpack.c.bf16 %v362_v39, %v361_v42  ;;  %v398_v5 = vld [vmem:[#allocation5 + $0x9a8] sm:$0xff]  ;;  %v359_v10 = vld [vmem:[#allocation5 + $0x870] sm:$0xff] }
  0xc3   :  { %2237 = vmatpush3.bf16.msra.mxu0 %v2236_v30  ;;  %v87_v30 = vld [vmem:[#allocation2 + $0x20] sm:$0xff]  ;;  %v386_v39 = vld [vmem:[#allocation5 + $0x948] sm:$0xff]  ;;  %v360_v12 = vld [vmem:[#allocation5 + $0x878] sm:$0xff] }
  0xc4   :  { %2239 = vmatprep.subr.bf16.mxu0 %v2238_v32  ;;  %v2258_v32 = vpack.c.bf16 %v312_v26, %v311_v25  ;;  %v2745_v55 = vrot.slane %v87_v30, %v2706_v13  ;;  %v383_v25 = vld [vmem:[#allocation5 + $0x930] sm:$0xff] }
  0xc5   :  { %2269 = vmatpush3.bf16.msra.mxu1 %v2268_v31  ;;  %v2288_v31 = vpack.c.bf16 %v326_v24, %v325_v22  ;;  %v352_v24 = vld [vmem:[#allocation5 + $0x838] sm:$0xff]  ;;  %v443_v40 = vld [vmem:[#allocation5 + $0xb10] sm:$0xff] }
  0xc6   :  { %2271 = vmatprep.subr.bf16.mxu1 %v2270_v37  ;;  %v2290_v37 = vpack.c.bf16 %v344_v28, %v343_v27  ;;  %v384_v27 = vld [vmem:[#allocation5 + $0x938] sm:$0xff]  ;;  %v369_v28 = vld [vmem:[#allocation5 + $0x8c0] sm:$0xff] }
  0xc7   :  { %2241 = vmatpush3.bf16.msra.mxu0 %v2240_v43  ;;  %v554_v43 = vcombine.high %v87_v30, %v87_v30  ;;  %v401_v30 = vld [vmem:[#allocation5 + $0x9c0] sm:$0xff] }
  0xc8   :  { %2243 = vmatprep.subr.bf16.mxu0 %v2242_v44  ;;  %v2292_v44 = vpack.c.bf16 %v328_v38, %v327_v36  ;;  %v353_v36 = vld [vmem:[#allocation5 + $0x840] sm:$0xff] }
  0xc9   :  { %2273 = vmatpush3.bf16.msra.mxu1 %v2272_v52  ;;  %v2260_v52 = vpack.c.bf16 %v296_v35, %v295_v34  ;;  %v2340_v34 = vpack.c.bf16 %v384_v27, %v383_v25  ;;  %v385_v38 = vld [vmem:[#allocation5 + $0x940] sm:$0xff]  ;;  %v410_v25 = vld [vmem:[#allocation5 + $0xa08] sm:$0xff] }
  0xca   :  { %2275 = vmatprep.subr.bf16.mxu1 %v2274_v49  ;;  %v377_v49 = vld [vmem:[#allocation5 + $0x900] sm:$0xff] }
  0xcb   :  { %2245 = vmatpush3.bf16.msra.mxu0 %v2244_v56  ;;  %v395_v56 = vld [vmem:[#allocation5 + $0x990] sm:$0xff]  ;;  %v2328_v59 = vpack.c.bf16 %v378_v51, %v377_v49  ;;  %v356_v49 = vld [vmem:[#allocation5 + $0x858] sm:$0xff] }
  0xcc   :  { %2247 = vmatprep.subr.bf16.mxu0 %v2246_v58  ;;  %v2748_v58 = vrot.slane %v554_v43, %v2706_v13  ;;  %v403_v43 = vld [vmem:[#allocation5 + $0x9d0] sm:$0xff] }
  0xcd   :  { %2277 = vmatpush3.bf16.msra.mxu1 %v2276_v57  ;;  %v396_v57 = vld [vmem:[#allocation5 + $0x998] sm:$0xff] }
  0xce   :  { %2279 = vmatprep.subr.bf16.mxu1 %v2278_v61  ;;  %v347_v61 = vld [vmem:[#allocation5 + $0x810] sm:$0xff]  ;;  %v2330_v0 = vpack.c.bf16 %v396_v57, %v395_v56  ;;  %v570_v6 = vcombine.high %v2748_v58, %v2748_v58  ;;  %v374_v56 = vld [vmem:[#allocation5 + $0x8e8] sm:$0xff]  ;;  %v405_v57 = vld [vmem:[#allocation5 + $0x9e0] sm:$0xff] }
  0xcf   :  { %2249 = vmatpush3.bf16.msra.mxu0 %v2248_v2  ;;  %v366_v2 = vld [vmem:[#allocation5 + $0x8a8] sm:$0xff]  ;;  %v2300_v7 = vpack.c.bf16 %v348_v62, %v347_v61  ;;  %v2318_v61 = vpack.c.bf16 %v374_v56, %v373_v54  ;;  %v357_v62 = vld [vmem:[#allocation5 + $0x860] sm:$0xff] }
  0xd0   :  { %2251 = vmatprep.subr.bf16.mxu0 %v2250_v4  ;;  %v397_v4 = vld [vmem:[#allocation5 + $0x9a0] sm:$0xff]  ;;  %v2302_v9 = vpack.c.bf16 %v366_v2, %v365_v1  ;;  %v390_v1 = vld [vmem:[#allocation5 + $0x968] sm:$0xff]  ;;  %v375_v2 = vld [vmem:[#allocation5 + $0x8f0] sm:$0xff] }
  0xd1   :  { %2281 = vmatpush3.bf16.msra.mxu1 %v2280_v3  ;;  %v569_v3 = vcombine.high %v2745_v55, %v2745_v55  ;;  %v2334_v16 = vpack.c.bf16 %v398_v5, %v397_v4  ;;  %v407_v4 = vld [vmem:[#allocation5 + $0x9f0] sm:$0xff]  ;;  %v408_v5 = vld [vmem:[#allocation5 + $0x9f8] sm:$0xff]  ;;  %v414_v54 = vld [vmem:[#allocation5 + $0xa28] sm:$0xff] }
  0xd2   :  { %2283 = vmatprep.subr.bf16.mxu1 %v2282_v8  ;;  %v2332_v8 = vpack.c.bf16 %v380_v45, %v379_v63  ;;  %v358_v63 = vld [vmem:[#allocation5 + $0x868] sm:$0xff]  ;;  %v445_v56 = vld [vmem:[#allocation5 + $0xb20] sm:$0xff] }
  0xd3   :  { %2253 = vmatpush3.bf16.msra.mxu0 %v2252_v17  ;;  %v382_v17 = vld [vmem:[#allocation5 + $0x928] sm:$0xff] }
  0xd4   :  { %2255 = vmatprep.subr.bf16.mxu0 %v2254_v19  ;;  %v399_v19 = vld [vmem:[#allocation5 + $0x9b0] sm:$0xff] }
  0xd5   :  { %2285 = vmatpush3.bf16.msra.mxu1 %v2284_v18  ;;  %v368_v18 = vld [vmem:[#allocation5 + $0x8b8] sm:$0xff]  ;;  %v2338_v26 = vpack.c.bf16 %v400_v20, %v399_v19  ;;  %v457_v19 = vld [vmem:[#allocation5 + $0xb80] sm:$0xff]  ;;  %v458_v20 = vld [vmem:[#allocation5 + $0xb88] sm:$0xff] }
  0xd6   :  { %2287 = vmatprep.subr.bf16.mxu1 %v2286_v23  ;;  %v351_v23 = vld [vmem:[#allocation5 + $0x830] sm:$0xff]  ;;  %v2390_v27 = vpack.c.bf16 %v458_v20, %v457_v19  ;;  %v436_v19 = vld [vmem:[#allocation5 + $0xad8] sm:$0xff] }
  0xd7   :  { %2257 = vmatpush3.bf16.msra.mxu0 %v2256_v29  ;;  %v370_v29 = vld [vmem:[#allocation5 + $0x8c8] sm:$0xff]  ;;  %v467_v20 = vld [vmem:[#allocation5 + $0xbd0] sm:$0xff] }
  0xd8   :  { %2259 = vmatprep.subr.bf16.mxu0 %v2258_v32  ;;  %v2308_v32 = vpack.c.bf16 %v352_v24, %v351_v23  ;;  %v2310_v35 = vpack.c.bf16 %v370_v29, %v369_v28  ;;  %v409_v24 = vld [vmem:[#allocation5 + $0xa00] sm:$0xff]  ;;  %v442_v28 = vld [vmem:[#allocation5 + $0xb08] sm:$0xff]  ;;  %v427_v29 = vld [vmem:[#allocation5 + $0xa90] sm:$0xff] }
  0xd9   :  { %2289 = vmatpush3.bf16.msra.mxu1 %v2288_v31  ;;  %v402_v31 = vld [vmem:[#allocation5 + $0x9c8] sm:$0xff] }
  0xda   :  { %2291 = vmatprep.subr.bf16.mxu1 %v2290_v37  ;;  %v354_v37 = vld [vmem:[#allocation5 + $0x848] sm:$0xff]  ;;  %v2342_v42 = vpack.c.bf16 %v402_v31, %v401_v30  ;;  %v428_v30 = vld [vmem:[#allocation5 + $0xa98] sm:$0xff] }
  0xdb   :  { %2261 = vmatpush3.bf16.msra.mxu0 %v2260_v52  ;;  %v404_v52 = vld [vmem:[#allocation5 + $0x9d8] sm:$0xff] }
  0xdc   :  { %2295 = vmatprep.subr.bf16.mxu0 %v2294_v46  ;;  %v2344_v46 = vpack.c.bf16 %v386_v39, %v385_v38  ;;  %v2346_v51 = vpack.c.bf16 %v404_v52, %v403_v43  ;;  %v2362_v38 = vpack.c.bf16 %v428_v30, %v427_v29  ;;  %v412_v39 = vld [vmem:[#allocation5 + $0xa18] sm:$0xff]  ;;  %v429_v52 = vld [vmem:[#allocation5 + $0xaa0] sm:$0xff]  ;;  %v438_v30 = vld [vmem:[#allocation5 + $0xae8] sm:$0xff] }
  0xdd   :  { %2293 = vmatpush3.bf16.msra.mxu1 %v2292_v44  ;;  %v2312_v44 = vpack.c.bf16 %v354_v37, %v353_v36  ;;  %v2360_v36 = vpack.c.bf16 %v410_v25, %v409_v24  ;;  %v444_v43 = vld [vmem:[#allocation5 + $0xb18] sm:$0xff]  ;;  %v419_v24 = vld [vmem:[#allocation5 + $0xa50] sm:$0xff]  ;;  %v437_v29 = vld [vmem:[#allocation5 + $0xae0] sm:$0xff] }
  0xde   :  { %2327 = vmatprep.subr.bf16.mxu1 %v2326_v50  ;;  %1097 = vmatmul.mubr.f32.vlgmr.msra.gmra.mrb[6].mxu0 %v2733_v11  ;;  %v367_v11 = vld [vmem:[#allocation5 + $0x8b0] sm:$0xff]  ;;  %v420_v25 = vld [vmem:[#allocation5 + $0xa58] sm:$0xff] }
  0xdf   :  { %2297 = vmatpush3.bf16.msra.mxu0 %v2296_v33  ;;  %1236 = vmatprep.mubr.f32.mxu0 %v569_v3  ;;  %v2306_v22 = vpack.c.bf16 %v368_v18, %v367_v11  ;;  %v387_v50 = vld [vmem:[#allocation5 + $0x950] sm:$0xff]  ;;  %v406_v33 = vld [vmem:[#allocation5 + $0x9e8] sm:$0xff]  ;;  %v376_v3 = vld [vmem:[#allocation5 + $0x8f8] sm:$0xff] }
  0xe0   :  { %1167 = vmatmul.mubr.f32.vlgmr.msra.gmra.mrb[6].mxu1 %v2736_v15  ;;  %2299 = vmatprep.subr.bf16.mxu0 %v2298_v60  ;;  %v2336_v15 = vpack.c.bf16 %v382_v17, %v381_v14  ;;  %v2348_v60 = vpack.c.bf16 %v388_v53, %v387_v50  ;;  %v2350_v45 = vpack.c.bf16 %v406_v33, %v405_v57  ;;  %v391_v14 = vld [vmem:[#allocation5 + $0x970] sm:$0xff]  ;;  %v392_v17 = vld [vmem:[#allocation5 + $0x978] sm:$0xff]  ;;  %v425_v11 = vld [vmem:[#allocation5 + $0xa80] sm:$0xff] }
  0xe1   :  { %2329 = vmatpush3.bf16.msra.mxu1 %v2328_v59  ;;  %1306 = vmatprep.mubr.f32.mxu1 %v570_v6  ;;  %v2316_v59 = vpack.c.bf16 %v356_v49, %v355_v48  ;;  %v2320_v6 = vpack.c.bf16 %v358_v63, %v357_v62  ;;  %v426_v18 = vld [vmem:[#allocation5 + $0xa88] sm:$0xff]  ;;  %v2396_v50 = vpack.c.bf16 %v444_v43, %v443_v40  ;;  %v413_v53 = vld [vmem:[#allocation5 + $0xa20] sm:$0xff] }
  0xe2   :  { %2331 = vmatprep.subr.bf16.mxu1 %v2330_v0  ;;  %v389_v0 = vld [vmem:[#allocation5 + $0x960] sm:$0xff]  ;;  %v2358_v23 = vpack.c.bf16 %v426_v18, %v425_v11  ;;  %v446_v33 = vld [vmem:[#allocation5 + $0xb28] sm:$0xff]  ;;  %v2368_v62 = vpack.c.bf16 %v414_v54, %v413_v53  ;;  %v435_v18 = vld [vmem:[#allocation5 + $0xad0] sm:$0xff] }
  0xe3   :  { %2301 = vmatpush3.bf16.msra.mxu0 %v2300_v7  ;;  %v88_v7 = vld [vmem:[#allocation2 + $0x28] sm:$0xff]  ;;  %v450_v11 = vld [vmem:[#allocation5 + $0xb48] sm:$0xff]  ;;  %v453_v40 = vld [vmem:[#allocation5 + $0xb60] sm:$0xff] }
  0xe4   :  { %2303 = vmatprep.subr.bf16.mxu0 %v2302_v9  ;;  %v2322_v9 = vpack.c.bf16 %v376_v3, %v375_v2  ;;  %v2757_v31 = vrot.slane %v88_v7, %v2706_v13  ;;  %v448_v3 = vld [vmem:[#allocation5 + $0xb38] sm:$0xff]  ;;  %v454_v43 = vld [vmem:[#allocation5 + $0xb68] sm:$0xff]  ;;  %v455_v54 = vld [vmem:[#allocation5 + $0xb70] sm:$0xff] }
  0xe5   :  { %2333 = vmatpush3.bf16.msra.mxu1 %v2332_v8  ;;  %v2352_v8 = vpack.c.bf16 %v390_v1, %v389_v0  ;;  %v415_v0 = vld [vmem:[#allocation5 + $0xa30] sm:$0xff] }
  0xe6   :  { %2335 = vmatprep.subr.bf16.mxu1 %v2334_v16  ;;  %v2354_v16 = vpack.c.bf16 %v408_v5, %v407_v4  ;;  %v447_v1 = vld [vmem:[#allocation5 + $0xb30] sm:$0xff]  ;;  %v433_v4 = vld [vmem:[#allocation5 + $0xac0] sm:$0xff]  ;;  %v434_v5 = vld [vmem:[#allocation5 + $0xac8] sm:$0xff] }
  0xe7   :  { %2305 = vmatpush3.bf16.msra.mxu0 %v2304_v21  ;;  %v571_v21 = vcombine.high %v88_v7, %v88_v7  ;;  %v466_v7 = vld [vmem:[#allocation5 + $0xbc8] sm:$0xff] }
  0xe8   :  { %2307 = vmatprep.subr.bf16.mxu0 %v2306_v22  ;;  %v2356_v22 = vpack.c.bf16 %v392_v17, %v391_v14  ;;  %v418_v14 = vld [vmem:[#allocation5 + $0xa48] sm:$0xff] }
  0xe9   :  { %2337 = vmatpush3.bf16.msra.mxu1 %v2336_v15  ;;  %v2324_v15 = vpack.c.bf16 %v360_v12, %v359_v10  ;;  %v2374_v10 = vpack.c.bf16 %v434_v5, %v433_v4  ;;  %v417_v12 = vld [vmem:[#allocation5 + $0xa40] sm:$0xff]  ;;  %v2612_v4 = vmov 0.0|0.0  }
  0xea   :  { %2339 = vmatprep.subr.bf16.mxu1 %v2338_v26  ;;  %v441_v26 = vld [vmem:[#allocation5 + $0xb00] sm:$0xff] }
  0xeb   :  { %2309 = vmatpush3.bf16.msra.mxu0 %v2308_v32  ;;  %v459_v32 = vld [vmem:[#allocation5 + $0xb90] sm:$0xff]  ;;  %v2392_v37 = vpack.c.bf16 %v442_v28, %v441_v26  ;;  %v452_v28 = vld [vmem:[#allocation5 + $0xb58] sm:$0xff] }
  0xec   :  { %2311 = vmatprep.subr.bf16.mxu0 %v2310_v35  ;;  %v2760_v35 = vrot.slane %v571_v21, %v2706_v13  ;;  %v461_v13 = vld [vmem:[#allocation5 + $0xba0] sm:$0xff]  ;;  %v468_v21 = vld [vmem:[#allocation5 + $0xbd8] sm:$0xff]  ;;  %v451_v26 = vld [vmem:[#allocation5 + $0xb50] sm:$0xff] }
  0xed   :  { %2341 = vmatpush3.bf16.msra.mxu1 %v2340_v34  ;;  %v460_v34 = vld [vmem:[#allocation5 + $0xb98] sm:$0xff] }
  0xee   :  { %2343 = vmatprep.subr.bf16.mxu1 %v2342_v42  ;;  %v411_v42 = vld [vmem:[#allocation5 + $0xa10] sm:$0xff]  ;;  %v2394_v41 = vpack.c.bf16 %v460_v34, %v459_v32  ;;  %v587_v48 = vcombine.high %v2760_v35, %v2760_v35  ;;  %v469_v32 = vld [vmem:[#allocation5 + $0xbe0] sm:$0xff]  ;;  %v470_v34 = vld [vmem:[#allocation5 + $0xbe8] sm:$0xff] }
  0xef   :  { %2313 = vmatpush3.bf16.msra.mxu0 %v2312_v44  ;;  %v430_v44 = vld [vmem:[#allocation5 + $0xaa8] sm:$0xff]  ;;  %v2364_v49 = vpack.c.bf16 %v412_v39, %v411_v42  ;;  %v421_v42 = vld [vmem:[#allocation5 + $0xa60] sm:$0xff] }
  0xf0   :  { %2315 = vmatprep.subr.bf16.mxu0 %v2314_v47  ;;  %v462_v47 = vld [vmem:[#allocation5 + $0xba8] sm:$0xff] }
  0xf1   :  { %2345 = vmatpush3.bf16.msra.mxu1 %v2344_v46  ;;  %v586_v46 = vcombine.high %v2757_v31, %v2757_v31  ;;  %v2398_v57 = vpack.c.bf16 %v462_v47, %v461_v13  ;;  %v422_v39 = vld [vmem:[#allocation5 + $0xa68] sm:$0xff]  ;;  %v472_v13 = vld [vmem:[#allocation5 + $0xbf8] sm:$0xff] }
  0xf2   :  { %2347 = vmatprep.subr.bf16.mxu1 %v2346_v51  ;;  %v2366_v51 = vpack.c.bf16 %v430_v44, %v429_v52  ;;  %v439_v52 = vld [vmem:[#allocation5 + $0xaf0] sm:$0xff]  ;;  %v440_v44 = vld [vmem:[#allocation5 + $0xaf8] sm:$0xff]  ;;  %v2384_v47 = vpack.c.bf16 %v422_v39, %v421_v42 }
  0xf3   :  { %2317 = vmatpush3.bf16.msra.mxu0 %v2316_v59  ;;  %v432_v59 = vld [vmem:[#allocation5 + $0xab8] sm:$0xff] }
  0xf4   :  { %2319 = vmatprep.subr.bf16.mxu0 %v2318_v61  ;;  %v464_v61 = vld [vmem:[#allocation5 + $0xbb8] sm:$0xff] }
  0xf5   :  { %2349 = vmatpush3.bf16.msra.mxu1 %v2348_v60  ;;  %v463_v60 = vld [vmem:[#allocation5 + $0xbb0] sm:$0xff] }
  0xf6   :  { %2351 = vmatprep.subr.bf16.mxu1 %v2350_v45  ;;  %v416_v45 = vld [vmem:[#allocation5 + $0xa38] sm:$0xff]  ;;  %v2402_v2 = vpack.c.bf16 %v464_v61, %v463_v60 }
  0xf7   :  { %2321 = vmatpush3.bf16.msra.mxu0 %v2320_v6  ;;  %v465_v6 = vld [vmem:[#allocation5 + $0xbc0] sm:$0xff] }
  0xf8   :  { %2323 = vmatprep.subr.bf16.mxu0 %v2322_v9  ;;  %v2404_v9 = vpack.c.bf16 %v448_v3, %v447_v1  ;;  %v2406_v17 = vpack.c.bf16 %v466_v7, %v465_v6  ;;  %v1453_v1 = vld [vmem:[#allocation8] sm:$0xff]  ;;  %v1455_v3 = vld [vmem:[#allocation8 + $0x10] sm:$0xff]  ;;  %v1456_v6 = vld [vmem:[#allocation8 + $0x18] sm:$0xff] }
  0xf9   :  { %2353 = vmatpush3.bf16.msra.mxu1 %v2352_v8  ;;  %v2372_v8 = vpack.c.bf16 %v416_v45, %v415_v0  ;;  %v1458_v7 = vld [vmem:[#allocation8 + $0x28] sm:$0xff] }
  0xfa   :  { %2355 = vmatprep.subr.bf16.mxu1 %v2354_v16  ;;  %v449_v16 = vld [vmem:[#allocation5 + $0xb40] sm:$0xff] }
  0xfb   :  { %2325 = vmatpush3.bf16.msra.mxu0 %v2324_v15  ;;  %v2376_v15 = vpack.c.bf16 %v418_v14, %v417_v12  ;;  %v1461_v14 = vld [vmem:[#allocation8 + $0x40] sm:$0xff] }
  0xfc   :  { %2359 = vmatprep.subr.bf16.mxu0 %v2358_v23  ;;  %v2378_v23 = vpack.c.bf16 %v436_v19, %v435_v18  ;;  %v1464_v18 = vld [vmem:[#allocation8 + $0x58] sm:$0xff] }
  0xfd   :  { %2357 = vmatpush3.bf16.msra.mxu1 %v2356_v22  ;;  %v2408_v22 = vpack.c.bf16 %v450_v11, %v449_v16  ;;  %v1462_v16 = vld [vmem:[#allocation8 + $0x48] sm:$0xff]  ;;  %v1463_v11 = vld [vmem:[#allocation8 + $0x50] sm:$0xff] }
  0xfe   :  { %2391 = vmatprep.subr.bf16.mxu1 %v2390_v27  ;;  %1237 = vmatmul.mubr.f32.vlgmr.msra.gmra.mrb[8].mxu0 %v2745_v55  ;;  %v431_v55 = vld [vmem:[#allocation5 + $0xab0] sm:$0xff]  ;;  %v2410_v27 = vpack.c.bf16 %v468_v21, %v467_v20  ;;  %v2438_v19 = vpack.c.bf16 %v1464_v18, %v1463_v11  ;;  %v1465_v21 = vld [vmem:[#allocation8 + $0x60] sm:$0xff] }
  0xff   :  { %2361 = vmatpush3.bf16.msra.mxu0 %v2360_v36  ;;  %1376 = vmatprep.mubr.f32.mxu0 %v586_v46  ;;  %v2370_v63 = vpack.c.bf16 %v432_v59, %v431_v55  ;;  %v2380_v36 = vpack.c.bf16 %v420_v25, %v419_v24  ;;  %v471_v46 = vld [vmem:[#allocation5 + $0xbf0] sm:$0xff]  ;;  %v1564_v59 = vld [vmem:[#allocation7] ss:$0 sm:$0xff] }
 0x100   :  { %1307 = vmatmul.mubr.f32.vlgmr.msra.gmra.mrb[8].mxu1 %v2748_v58  ;;  %2363 = vmatprep.subr.bf16.mxu0 %v2362_v38  ;;  %v2400_v58 = vpack.c.bf16 %v446_v33, %v445_v56  ;;  %v2382_v38 = vpack.c.bf16 %v438_v30, %v437_v29  ;;  %v2418_v53 = vpack.c.bf16 %v472_v13, %v471_v46  ;;  %v456_v56 = vld [vmem:[#allocation5 + $0xb78] sm:$0xff] }
 0x101   :  { %2393 = vmatpush3.bf16.msra.mxu1 %v2392_v37  ;;  %1446 = vmatprep.mubr.f32.mxu1 %v587_v48  ;;  %v2412_v37 = vpack.c.bf16 %v452_v28, %v451_v26  ;;  %v2416_v48 = vpack.c.bf16 %v454_v43, %v453_v40  ;;  %v2420_v33 = vpack.c.bf16 %v456_v56, %v455_v54  ;;  %v1467_v29 = vld [vmem:[#allocation8 + $0x70] sm:$0xff]  ;;  %v1468_v30 = vld [vmem:[#allocation8 + $0x78] sm:$0xff] }
 0x102   :  { %2395 = vmatprep.subr.bf16.mxu1 %v2394_v41  ;;  %v2414_v41 = vpack.c.bf16 %v470_v34, %v469_v32  ;;  %v2444_v32 = vpack.c.bf16 %v1468_v30, %v1467_v29 }
 0x103   :  { %2365 = vmatpush3.bf16.msra.mxu0 %v2364_v49  ;;  %v2386_v49 = vpack.c.bf16 %v440_v44, %v439_v52 }
 0x104   :  { %2367 = vmatprep.subr.bf16.mxu0 %v2366_v51  ;;  %v424_v51 = vld [vmem:[#allocation5 + $0xa78] sm:$0xff] }
 0x105   :  { %2397 = vmatpush3.bf16.msra.mxu1 %v2396_v50  ;;  %v423_v50 = vld [vmem:[#allocation5 + $0xa70] sm:$0xff] }
 0x106   :  { %2399 = vmatprep.subr.bf16.mxu1 %v2398_v57  ;;  %v2388_v57 = vpack.c.bf16 %v424_v51, %v423_v50 }
 0x107   :  { %2369 = vmatpush3.bf16.msra.mxu0 %v2368_v62 }
 0x108   :  { %2371 = vmatprep.subr.bf16.mxu0 %v2370_v63 }
 0x109   :  { %2401 = vmatpush3.bf16.msra.mxu1 %v2400_v58 }
 0x10a   :  { %2403 = vmatprep.subr.bf16.mxu1 %v2402_v2  ;;  %v1454_v2 = vld [vmem:[#allocation8 + $0x8] sm:$0xff] }
 0x10b   :  { %2373 = vmatpush3.bf16.msra.mxu0 %v2372_v8  ;;  %v2423_v5 = vpack.c.bf16 %v1454_v2, %v1453_v1 }
 0x10c   :  { %2375 = vmatprep.subr.bf16.mxu0 %v2374_v10  ;;  %v1460_v10 = vld [vmem:[#allocation8 + $0x38] sm:$0xff] }
 0x10d   :  { %2405 = vmatpush3.bf16.msra.mxu1 %v2404_v9  ;;  %v1459_v9 = vld [vmem:[#allocation8 + $0x30] sm:$0xff] }
 0x10e   :  { %2407 = vmatprep.subr.bf16.mxu1 %v2406_v17  ;;  %v2432_v12 = vpack.c.bf16 %v1460_v10, %v1459_v9  ;;  %v2435_v17 = vpack.c.bf16 %v1462_v16, %v1461_v14 }
 0x10f   :  { %2377 = vmatpush3.bf16.msra.mxu0 %v2376_v15  ;;  %v1466_v15 = vld [vmem:[#allocation8 + $0x68] sm:$0xff] }
 0x110   :  { %2379 = vmatprep.subr.bf16.mxu0 %v2378_v23  ;;  %v2441_v24 = vpack.c.bf16 %v1466_v15, %v1465_v21 }
 0x111   :  { %2409 = vmatpush3.bf16.msra.mxu1 %v2408_v22 }
 0x112   :  { %2411 = vmatprep.subr.bf16.mxu1 %v2410_v27 }
 0x113   :  { %2381 = vmatpush3.bf16.msra.mxu0 %v2380_v36  ;;  %v2614_v36 = vmov 0.0  }
 0x114   :  { %2383 = vmatprep.subr.bf16.mxu0 %v2382_v38 }
 0x115   :  { %2413 = vmatpush3.bf16.msra.mxu1 %v2412_v37 }
 0x116   :  { %2415 = vmatprep.subr.bf16.mxu1 %v2414_v41 }
 0x117   :  { %2385 = vmatpush3.bf16.msra.mxu0 %v2384_v47 }
 0x118   :  { %2387 = vmatprep.subr.bf16.mxu0 %v2386_v49 }
 0x119   :  { %2417 = vmatpush3.bf16.msra.mxu1 %v2416_v48 }
 0x11a   :  { %2419 = vmatprep.subr.bf16.mxu1 %v2418_v53 }
 0x11b   :  { %2389 = vmatpush3.bf16.msra.mxu0 %v2388_v57 }
 0x11c   :  { %2422 = vmatprep.subr.bf16.mxu0 %v2612_v4 }
 0x11d   :  { %2421 = vmatpush3.bf16.msra.mxu1 %v2420_v33 }
 0x11e   :  { %1377 = vmatmul.mubr.f32.vlgmr.msra.gmra.mrb[10].mxu0 %v2757_v31  ;;  %v2426_v31 = vpack.c.bf16 %v1456_v6, %v1455_v3 }
 0x11f   :  { %2424 = vmatpush3.bf16.msra.mxu0 %v2423_v5  ;;  %2035 = vmatprep.mubr.msk.f32.mxu0 %vm2613_vm0, %v2614_v36 }
 0x120   :  { %1447 = vmatmul.mubr.f32.vlgmr.msra.gmra.mrb[10].mxu1 %v2760_v35  ;;  %2425 = vmatprep.subr.bf16.mxu0 %v2612_v4  ;;  %v1457_v35 = vld [vmem:[#allocation8 + $0x20] sm:$0xff] }
 0x121   :  { %v2429_v8 = vpack.c.bf16 %v1458_v7, %v1457_v35 }
 0x123   :  { %2427 = vmatpush3.bf16.msra.mxu0 %v2426_v31 }
 0x124   :  { %2428 = vmatprep.subr.bf16.mxu0 %v2612_v4 }
 0x127   :  { %2430 = vmatpush3.bf16.msra.mxu0 %v2429_v8 }
 0x128   :  { %2431 = vmatprep.subr.bf16.mxu0 %v2612_v4 }
 0x12b   :  { %2433 = vmatpush3.bf16.msra.mxu0 %v2432_v12 }
 0x12c   :  { %2434 = vmatprep.subr.bf16.mxu0 %v2612_v4 }
 0x12f   :  { %2436 = vmatpush3.bf16.msra.mxu0 %v2435_v17 }
 0x130   :  { %2437 = vmatprep.subr.bf16.mxu0 %v2612_v4 }
 0x133   :  { %2439 = vmatpush3.bf16.msra.mxu0 %v2438_v19 }
 0x134   :  { %2440 = vmatprep.subr.bf16.mxu0 %v2612_v4 }
 0x137   :  { %2442 = vmatpush3.bf16.msra.mxu0 %v2441_v24 }
 0x138   :  { %2443 = vmatprep.subr.bf16.mxu0 %v2612_v4  ;;  %v1565_v4 = vld [vmem:[#allocation10] ss:$0 sm:$0xff] }
 0x13b   :  { %2445 = vmatpush3.bf16.msra.mxu0 %v2444_v32 }
 0x151   :  { %v1598_v55 = vpop.f32.mrb[0].mxu0 }
 0x152   :  { %v1599_v60 = vpop.f32.mrb[1].mxu0 }
 0x153   :  { %v1633_v61 = vpop.f32.mrb[0].mxu1  ;;  %v1600_v62 = vadd.f32 %v1599_v60, %v1598_v55 }
 0x154   :  { %v1634_v58 = vpop.f32.mrb[1].mxu1 }
 0x155   :  { %v1635_v63 = vadd.f32 %v1634_v58, %v1633_v61  ;;  %v679_v0 = vadd.f32 %v1600_v62, %v1564_v59 }
 0x157   :  { %v749_v45 = vadd.f32 %v1635_v63, %v679_v0 }
 0x171   :  { %v1668_v20 = vpop.f32.mrb[2].mxu0 }
 0x172   :  { %v1669_v22 = vpop.f32.mrb[3].mxu0 }
 0x173   :  { %v1703_v23 = vpop.f32.mrb[2].mxu1  ;;  %v1670_v25 = vadd.f32 %v1669_v22, %v1668_v20 }
 0x174   :  { %v1704_v26 = vpop.f32.mrb[3].mxu1 }
 0x175   :  { %v1705_v27 = vadd.f32 %v1704_v26, %v1703_v23  ;;  %v819_v28 = vadd.f32 %v1670_v25, %v749_v45 }
 0x177   :  { %v889_v34 = vadd.f32 %v1705_v27, %v819_v28 }
 0x191   :  { %v1738_v37 = vpop.f32.mrb[4].mxu0 }
 0x192   :  { %v1739_v38 = vpop.f32.mrb[5].mxu0 }
 0x193   :  { %v1773_v42 = vpop.f32.mrb[4].mxu1  ;;  %v1740_v39 = vadd.f32 %v1739_v38, %v1738_v37 }
 0x194   :  { %v1774_v40 = vpop.f32.mrb[5].mxu1 }
 0x195   :  { %v1775_v41 = vadd.f32 %v1774_v40, %v1773_v42  ;;  %v959_v43 = vadd.f32 %v1740_v39, %v889_v34 }
 0x197   :  { %v1029_v52 = vadd.f32 %v1775_v41, %v959_v43 }
 0x1b1   :  { %v1808_v44 = vpop.f32.mrb[6].mxu0 }
 0x1b2   :  { %v1809_v46 = vpop.f32.mrb[7].mxu0 }
 0x1b3   :  { %v1843_v13 = vpop.f32.mrb[6].mxu1  ;;  %v1810_v47 = vadd.f32 %v1809_v46, %v1808_v44 }
 0x1b4   :  { %v1844_v48 = vpop.f32.mrb[7].mxu1 }
 0x1b5   :  { %v1845_v49 = vadd.f32 %v1844_v48, %v1843_v13  ;;  %v1099_v50 = vadd.f32 %v1810_v47, %v1029_v52 }
 0x1b7   :  { %v1169_v51 = vadd.f32 %v1845_v49, %v1099_v50 }
 0x1d1   :  { %v1878_v53 = vpop.f32.mrb[8].mxu0 }
 0x1d2   :  { %v1879_v54 = vpop.f32.mrb[9].mxu0 }
 0x1d3   :  { %v1913_v56 = vpop.f32.mrb[8].mxu1  ;;  %v1880_v57 = vadd.f32 %v1879_v54, %v1878_v53 }
 0x1d4   :  { %v1914_v33 = vpop.f32.mrb[9].mxu1 }
 0x1d5   :  { %v1915_v55 = vadd.f32 %v1914_v33, %v1913_v56  ;;  %v1239_v59 = vadd.f32 %v1880_v57, %v1169_v51 }
 0x1d7   :  { %v1309_v60 = vadd.f32 %v1915_v55, %v1239_v59 }
 0x1f1   :  { %v1948_v61 = vpop.f32.mrb[10].mxu0 }
 0x1f2   :  { %v1949_v62 = vpop.f32.mrb[11].mxu0 }
 0x1f3   :  { %v1983_v58 = vpop.f32.mrb[10].mxu1  ;;  %v1950_v63 = vadd.f32 %v1949_v62, %v1948_v61 }
 0x1f4   :  { %v1984_v0 = vpop.f32.mrb[11].mxu1 }
 0x1f5   :  { %v1985_v45 = vadd.f32 %v1984_v0, %v1983_v58  ;;  %v1379_v1 = vadd.f32 %v1950_v63, %v1309_v60 }
 0x1f7   :  { %v1449_v2 = vadd.f32 %v1985_v45, %v1379_v1 }
 0x1f9   :  { %v1452_v3 = vmax.f32 %v1449_v2, 0.0 }
 0x1fb   :  { %2036 = vmatmul.mubr.f32.vlgmr.msra.gmra.mrb[12].mxu0 %v1452_v3 }
 0x2ce   :  { %v1542_v5 = vpop.f32.mrb[12].mxu0 }
 0x2cf   :  { %v1543_v6 = vadd.f32 %v1565_v4, %v1542_v5  ;;  %v2037_v31 = vpop.f32.mrb[13].mxu0 }
 0x2d1   :  { %1546 = vst [vmem:[#allocation11] sm:$0x3] %v1543_v6 }
 0x2d2   :  { %2585 = shalt.err (!%p2582_p2)
}
 0x2d3   :  { %s2586_s30 = scalar_lea.hbm %s2787_s5, 32 }
 0x2d4   :  { %p2587_p3 = scmp.ne.s32.totalorder %s2787_s5, %s2586_s30  ;;  %p2590_p4 = scmp.lt.u32.totalorder %s2586_s30, %s2787_s5 }
 0x2d6   :  { %p2592_p5 = pnand %p2590_p4, %p2587_p3 }
 0x2d8   :  { %2595 = shalt.err (!%p2592_p5)
}
 0x2d9   :  { %1556 = dma.vmem_to_hbm [thread:$0]  %s1554_s27, 32, %s2787_s5, [#allocation4]  }
 0x2da   :  { %2602 = dma.done.wait [#allocation4], 32  }
 0x2db   :  { %2603 = vsyncadd [#allocation4], 4294967264 }
 0x2dc   :  { %1560 = vsyncpa [#allocation3], 1 }
 0x2dd   :  { %1561 = vsyncpa [#allocation6], 1 }
 0x2de   :  { %1562 = vsyncpa [#allocation9], 1 }
 0x2df   :  { %1563 = vsyncpa [#allocation4], 1 }

</bundles_post_ra>
